<compile_context>
chip_gen: v5e
topology: v5e:2x2
jax: 0.10.0
libtpu: 0.0.40
codegen_flags: <defaults>
</compile_context>

<pallas_src>
import functools

import jax
import jax.numpy as jnp
from jax.experimental import pallas as pl
from jax.experimental.pallas import tpu as pltpu

COMPUTE_DTYPE = jnp.bfloat16           # MXU operand dtype (accumulation is f32)
BAND_VMEM_BUDGET = 8 * 1024 * 1024     # target live bytes per band step
VMEM_LIMIT_BYTES = 48 * 1024 * 1024    # scoped VMEM limit (fits v5e/v6e/v7x)

NDIM = 2
ENC_CH = (16, 32, 32, 32, 32)
DEC_CH = (32, 32, 32, 32)
OUT_CH = (16, 16)


# ----------------------------------------------------------------------------
# Kernel: row-band conv as a few MXU dots (one per input x kernel-row group).
# ----------------------------------------------------------------------------
def _conv_band_kernel(*refs, chans, groups, w_row, m, has_halo, lrelu, alpha):
    """Computes TH output rows of one image.

    refs layout: per input t -> (top_halo, band, bot_halo) if has_halo else
    (band,); then wmat [K, Cout_p] bf16, bias [1, Cout_p] f32, out [m, Cout_p].
    """
    n_in = len(chans)
    per_in = 3 if has_halo else 1
    w_ref = refs[per_in * n_in]
    b_ref = refs[per_in * n_in + 1]
    o_ref = refs[per_in * n_in + 2]

    b_idx = pl.program_id(1)
    last = pl.num_programs(1) - 1

    # Column-position masks for taps whose horizontal shift wraps a row
    # boundary of the flattened band (hoisted out of the tap loops).
    col = jax.lax.broadcasted_iota(jnp.int32, (m, 1), 0)
    if (w_row & (w_row - 1)) == 0:                  # power-of-two width
        col = jnp.bitwise_and(col, w_row - 1)
    else:
        col = jax.lax.rem(col, w_row)
    not_left = col != 0
    not_right = col != (w_row - 1)

    cout_p = b_ref.shape[-1]
    acc = jnp.zeros((m, cout_p), jnp.float32)
    k_off = 0
    for t in range(n_in):
        c = chans[t]
        if has_halo:
            top_ref, band_ref, bot_ref = refs[3 * t:3 * t + 3]
            band = band_ref[...]
            zrow = jnp.zeros((w_row, c), band.dtype)
            top = jnp.where(b_idx == 0, zrow, top_ref[...])     # zero above image
            bot = jnp.where(b_idx == last, zrow, bot_ref[...])  # zero below image
        else:
            band = refs[t][...]
            top = jnp.zeros((w_row, c), band.dtype)
            bot = jnp.zeros((w_row, c), band.dtype)
        zpix = jnp.zeros((1, c), band.dtype)
        # Band-local zero-padded pixel buffer (bounded by band size, not H*W):
        #   [1 zero px][halo row above][band rows][halo row below][1 zero px]
        buf = jnp.concatenate([zpix, top, band, bot, zpix], axis=0)

        for taps in groups[t]:
            pieces = []
            for off, msk in taps:
                win = buf[off:off + m, :]                        # static slice
                if msk == 'L':
                    win = jnp.where(not_left, win, jnp.zeros_like(win))
                elif msk == 'R':
                    win = jnp.where(not_right, win, jnp.zeros_like(win))
                pieces.append(win)
            slab = pieces[0] if len(pieces) == 1 else jnp.concatenate(pieces, -1)
            kw = len(taps) * c
            acc = acc + jnp.dot(slab, w_ref[k_off:k_off + kw, :],
                                preferred_element_type=jnp.float32)
            k_off += kw

    acc = acc + b_ref[...]
    if lrelu:
        acc = jnp.where(acc >= 0.0, acc, alpha * acc)
    # TODO(synk): repack [m, Cout_p] -> [m*(Cout_p/128), 128] before the store
    # for fully lane-dense vst once Mosaic's minor-dim reshape path is verified.
    o_ref[...] = acc.astype(o_ref.dtype)


def _tap_groups(w_row, stride):
    if stride == 1:
        # 3 row-groups (ky) x 3 taps (kx); offsets index the padded band buffer.
        return tuple(
            tuple((ky * w_row + kx,
                   'L' if kx == 0 else ('R' if kx == 2 else None))
                  for kx in range(3))
            for ky in range(3))
    # stride-2 phase formulation: 2x2 taps over the (py,px)-phase image.
    return tuple(
        tuple(((sy + 1) * w_row + sx + 1, 'L' if sx == -1 else None)
              for sx in (-1, 0))
        for sy in (-1, 0))


def _pick_band_rows(h, w, cin_total, cout_p):
    if w % 8 != 0:        # tiny deep levels: whole (tiny) image in one band
        return h
    # rough per-output-row bytes: dbl-buffered bf16 band + pad buffer copy,
    # one 3-tap bf16 slab, the f32 accumulator, dbl-buffered bf16 output band.
    per_row = w * (cin_total * 2 * 2 + 3 * cin_total * 2
                   + cout_p * 4 + cout_p * 2 * 2)
    th = h
    while th > 1 and th % 2 == 0 and th * per_row > BAND_VMEM_BUDGET:
        th //= 2
    return th


def _halo_top_map(n, b, *, th):
    return (n, jnp.maximum(b * th - 1, 0), 0)


def _halo_bot_map(n, b, *, th, h):
    return (n, jnp.minimum((b + 1) * th, h - 1), 0)


def _band_map(n, b):
    return (n, b, 0)


def _full_map(n, b):
    return (n, 0, 0)


def _rep_map(n, b):
    return (0, 0)


# ----------------------------------------------------------------------------
# Wrapper: fused (multi-input) 3x3 conv, padding=1, stride in {1, 2}.
# ----------------------------------------------------------------------------
def conv_fused(xs, wmat, bias, *, stride=1, lrelu=True, alpha=0.2,
               cout=None, out_dtype=None, band_rows=None):
    """3x3 conv over the channel-concat of `xs` (concat fused into the kernel).

    xs   : list of NHWC arrays sharing N, H, W.
    wmat : [K, Cout_p] packed weights (see pack_conv); bias: [1, Cout_p] f32.
    """
    if out_dtype is None:
        out_dtype = xs[0].dtype
    n, h, w = xs[0].shape[0], xs[0].shape[1], xs[0].shape[2]

    if stride == 2:
        assert len(xs) == 1 and h % 2 == 0 and w % 2 == 0
        x = xs[0]
        # TODO(synk): read the 4 parity phases in-kernel (strided loads) or have
        # the producing layer store phase-major, instead of this XLA shuffle.
        xs = [jnp.concatenate(
            [x[:, py::2, px::2, :] for py in (0, 1) for px in (0, 1)], axis=-1)]
        h, w = h // 2, w // 2
    elif stride != 1:
        raise ValueError("stride must be 1 or 2")

    xs = [x.astype(COMPUTE_DTYPE) for x in xs]
    chans = tuple(int(x.shape[-1]) for x in xs)
    k_total, cout_p = wmat.shape
    hw = h * w

    th = band_rows if band_rows is not None else _pick_band_rows(
        h, w, sum(chans), cout_p)
    assert h % th == 0, (h, th)
    nb = h // th
    has_halo = nb > 1
    m = th * w
    if has_halo:
        assert w % 8 == 0 and m % 8 == 0

    groups = tuple(_tap_groups(w, stride) for _ in chans)

    in_specs, args = [], []
    for x, c in zip(xs, chans):
        x_flat = x.reshape(n, hw, c)     # (N, H*W, C): free reshape in HBM
        if has_halo:
            in_specs.append(pl.BlockSpec((None, w, c),
                                         functools.partial(_halo_top_map, th=th)))
            in_specs.append(pl.BlockSpec((None, m, c), _band_map))
            in_specs.append(pl.BlockSpec((None, w, c),
                                         functools.partial(_halo_bot_map, th=th, h=h)))
            args += [x_flat, x_flat, x_flat]
        else:
            in_specs.append(pl.BlockSpec((None, m, c), _full_map))
            args.append(x_flat)
    in_specs.append(pl.BlockSpec((k_total, cout_p), _rep_map))
    in_specs.append(pl.BlockSpec((1, cout_p), _rep_map))
    args += [wmat, bias]

    kernel = functools.partial(
        _conv_band_kernel, chans=chans, groups=groups, w_row=w, m=m,
        has_halo=has_halo, lrelu=lrelu, alpha=alpha)

    out = pl.pallas_call(
        kernel,
        out_shape=jax.ShapeDtypeStruct((n, hw, cout_p), out_dtype),
        grid_spec=pltpu.PrefetchScalarGridSpec(
            num_scalar_prefetch=0,
            grid=(n, nb),
            in_specs=in_specs,
            out_specs=pl.BlockSpec((None, m, cout_p), _band_map),
        ),
        compiler_params=pltpu.CompilerParams(
            dimension_semantics=("parallel", "parallel"),
            vmem_limit_bytes=VMEM_LIMIT_BYTES),
    )(*args)

    out = out.reshape(n, h, w, cout_p)
    if cout is not None and cout != cout_p:
        out = out[..., :cout]
    return out


# ----------------------------------------------------------------------------
# One-time weight packing (hoisted out of the forward pass).
# ----------------------------------------------------------------------------
def pack_conv(w, b, *, stride=1, cin_splits=None):
    """Pack a [3,3,Cin,Cout] conv into the kernel's [K, Cout_p] bf16 layout."""
    cout = int(w.shape[-1])
    cout_p = max(8, ((cout + 7) // 8) * 8)          # lane-pad narrow heads
    if cout_p != cout:
        w = jnp.concatenate(
            [w, jnp.zeros((3, 3, w.shape[2], cout_p - cout), w.dtype)], axis=-1)
        b = jnp.concatenate([b, jnp.zeros((cout_p - cout,), b.dtype)], axis=0)
    cin = int(w.shape[2])
    if stride == 1:
        if cin_splits is None:
            cin_splits = (cin,)
        assert sum(cin_splits) == cin
        blocks, off = [], 0
        for c in cin_splits:                        # per fused-input block
            blocks.append(w[:, :, off:off + c, :].reshape(9 * c, cout_p))
            off += c
        wmat = blocks[0] if len(blocks) == 1 else jnp.concatenate(blocks, axis=0)
    elif stride == 2:
        assert cin_splits is None or tuple(cin_splits) == (cin,)
        blocks = []
        for sy, sx in ((-1, -1), (-1, 0), (0, -1), (0, 0)):
            for py in (0, 1):
                for px in (0, 1):
                    dy, dx = 2 * sy + py, 2 * sx + px
                    if -1 <= dy <= 1 and -1 <= dx <= 1:
                        blocks.append(w[dy + 1, dx + 1])      # [Cin, Cout_p]
                    else:
                        blocks.append(jnp.zeros((cin, cout_p), w.dtype))
        wmat = jnp.concatenate(blocks, axis=0)
    else:
        raise ValueError("stride must be 1 or 2")
    return wmat.astype(COMPUTE_DTYPE), b.astype(jnp.float32).reshape(1, cout_p)


def _init_conv(key, cin, cout):
    kw, kb = jax.random.split(key)
    scale = 1.0 / jnp.sqrt(9.0 * cin)
    w = scale * jax.random.normal(kw, (3, 3, cin, cout), jnp.float32)
    b = 0.01 * jax.random.normal(kb, (cout,), jnp.float32)
    return w, b


def init_unet_params(key):
    params = {"enc": [], "dec": [], "out": []}
    keys = jax.random.split(key, len(ENC_CH) + len(DEC_CH) + len(OUT_CH) + 1)
    ki = 0
    for i, c in enumerate(ENC_CH):
        cin = 2 if i == 0 else ENC_CH[i - 1]
        params["enc"].append(_init_conv(keys[ki], cin, c)); ki += 1
    for i, c in enumerate(DEC_CH):
        cin = ENC_CH[-1] if i == 0 else DEC_CH[i - 1] + ENC_CH[-i - 1]
        params["dec"].append(_init_conv(keys[ki], cin, c)); ki += 1
    for i, c in enumerate(OUT_CH):
        cin = DEC_CH[-1] + ENC_CH[0] if i == 0 else OUT_CH[i - 1]
        params["out"].append(_init_conv(keys[ki], cin, c)); ki += 1
    params["out"].append(_init_conv(keys[ki], OUT_CH[-1], NDIM)); ki += 1
    return params


def pack_unet_params(params):
    """One-time im2col packing of all conv weights (bf16 in HBM)."""
    packed = {"enc": [], "dec": [], "out": []}
    for i, (w, b) in enumerate(params["enc"]):
        packed["enc"].append(pack_conv(w, b, stride=1 if i == 0 else 2))
    for i, (w, b) in enumerate(params["dec"]):
        splits = None if i == 0 else (DEC_CH[i - 1], ENC_CH[-i - 1])
        packed["dec"].append(pack_conv(w, b, stride=1, cin_splits=splits))
    for i, (w, b) in enumerate(params["out"]):
        splits = (DEC_CH[-1], ENC_CH[0]) if i == 0 else None
        packed["out"].append(pack_conv(w, b, stride=1, cin_splits=splits))
    return packed


# ----------------------------------------------------------------------------
# UNet forward pass (matches the PyTorch module's semantics).
# ----------------------------------------------------------------------------
def unet_forward(packed, tar, src):
    # tar, src: [N, 1, H, W] (NCHW, like PyTorch)
    x = jnp.concatenate([tar, src], axis=1)
    x = jnp.transpose(x, (0, 2, 3, 1)).astype(COMPUTE_DTYPE)     # NHWC bf16

    # encoder
    fm_enc = [x]
    for i, (wmat, bias) in enumerate(packed["enc"]):
        stride = 1 if i == 0 else 2
        fm_enc.append(conv_fused([fm_enc[-1]], wmat, bias,
                                 stride=stride, lrelu=True))

    # decoder: the skip-concat is fused into the next conv (`cur` is a list of
    # tensors only ever concatenated inside the kernel).
    cur = [fm_enc[-1]]
    for i, (wmat, bias) in enumerate(packed["dec"]):
        y = conv_fused(cur, wmat, bias, stride=1, lrelu=True)
        # TODO(synk): fuse the 2x nearest-upsample into the conv's output store
        # (or the next conv's phase read) to avoid this 4x HBM write + re-read.
        y = jnp.repeat(jnp.repeat(y, 2, axis=1), 2, axis=2)
        cur = [y, fm_enc[-2 - i]]

    # output convs: LeakyReLU on all but the final flow conv (emitted in f32).
    # TODO(synk): fuse these three full-resolution convs into one kernel with
    # VMEM-resident intermediates (removes two narrow-channel HBM round trips).
    n_out = len(packed["out"])
    y_list = cur
    for i, (wmat, bias) in enumerate(packed["out"]):
        is_last = (i == n_out - 1)
        y = conv_fused(y_list, wmat, bias, stride=1, lrelu=not is_last,
                       cout=NDIM if is_last else None,
                       out_dtype=jnp.float32 if is_last else None)
        y_list = [y]

    return [jnp.transpose(y, (0, 3, 1, 2))]                      # back to NCHW


# ----------------------------------------------------------------------------
# Pure-JAX reference conv + runtime sanity checks of the kernel math.
# ----------------------------------------------------------------------------
def _conv_ref(x, w, b, stride, lrelu, alpha=0.2):
    y = jax.lax.conv_general_dilated(
        x.astype(jnp.float32), w.astype(jnp.float32),
        window_strides=(stride, stride), padding=((1, 1), (1, 1)),
        dimension_numbers=("NHWC", "HWIO", "NHWC"))
    y = y + b.astype(jnp.float32)[None, None, None, :]
    if lrelu:
        y = jnp.where(y >= 0.0, y, alpha * y)
    return y


def _check_conv(key, *, n, h, w, cins, cout, stride, band_rows):
    keys = jax.random.split(key, len(cins) + 2)
    xs = [jax.random.normal(keys[i], (n, h, w, c), jnp.float32)
          for i, c in enumerate(cins)]
    wts = 0.2 * jax.random.normal(keys[-2], (3, 3, sum(cins), cout), jnp.float32)
    bias = 0.1 * jax.random.normal(keys[-1], (cout,), jnp.float32)
    splits = tuple(cins) if (stride == 1 and len(cins) > 1) else None
    wmat, bvec = pack_conv(wts, bias, stride=stride, cin_splits=splits)
    got = conv_fused(xs, wmat, bvec, stride=stride, lrelu=True, cout=cout,
                     out_dtype=jnp.float32, band_rows=band_rows)
    got = jax.block_until_ready(got)
    xcat = xs[0] if len(xs) == 1 else jnp.concatenate(xs, axis=-1)
    ref = _conv_ref(xcat, wts, bias, stride, True)
    assert got.shape == ref.shape, (got.shape, ref.shape)
    err = float(jnp.max(jnp.abs(got - ref)))
    tol = 3e-2 * (float(jnp.max(jnp.abs(ref))) + 1.0)
    assert err <= tol, (stride, band_rows, err, tol)


if __name__ == "__main__":
    key = jax.random.PRNGKey(0)
    k_params, k_tar, k_src, k_conv = jax.random.split(key, 4)

    # --- conv kernel sanity checks: single-band, banded-with-halo, stride-2
    # --- phase form, and fused multi-input (skip-concat) paths ---------------
    kc = jax.random.split(k_conv, 4)
    _check_conv(kc[0], n=2, h=16, w=16, cins=(16,), cout=16, stride=1,
                band_rows=None)
    _check_conv(kc[1], n=2, h=16, w=16, cins=(16,), cout=16, stride=1,
                band_rows=4)
    _check_conv(kc[2], n=2, h=16, w=16, cins=(16,), cout=16, stride=2,
                band_rows=4)
    _check_conv(kc[3], n=2, h=16, w=16, cins=(8, 16), cout=32, stride=1,
                band_rows=8)

    # --- full UNet forward ----------------------------------------------------
    params = init_unet_params(k_params)
    packed = pack_unet_params(params)     # one-time weight packing (bf16)

    N, H, W = 2, 16, 16
    tar = jax.random.normal(k_tar, (N, 1, H, W), jnp.float32)
    src = jax.random.normal(k_src, (N, 1, H, W), jnp.float32)

    fwd = jax.jit(unet_forward)
    out = fwd(packed, tar, src)
    y = jax.block_until_ready(out[0])

    assert y.shape == (N, NDIM, H, W), y.shape
    assert bool(jnp.all(jnp.isfinite(y)))
    print("KERNEL_OK")
</pallas_src>

<mosaic_0001>
module attributes {stable_mosaic.version = 11 : i64} {
  func.func @_conv_band_kernel(%arg0: i32, %arg1: i32, %arg2: memref<1x256x16xbf16, #tpu.memory_space<vmem>>, %arg3: memref<144x16xbf16, #tpu.memory_space<vmem>>, %arg4: memref<1x16xf32, #tpu.memory_space<vmem>>, %arg5: memref<1x256x16xf32, #tpu.memory_space<vmem>>) attributes {dimension_semantics = [#tpu.dimension_semantics<parallel>, #tpu.dimension_semantics<parallel>], iteration_bounds = array<i64: 2, 1>, scalar_prefetch = 0 : i64, scratch_operands = 0 : i64, tpu.core_type = #tpu.core_type<tc>, window_params = [{transform_indices = @transform_0, window_bounds = array<i64: 1, 256, 16>}, {pipeline_mode = #tpu.pipeline_mode<synchronous>, transform_indices = @transform_1, window_bounds = array<i64: 144, 16>}, {pipeline_mode = #tpu.pipeline_mode<synchronous>, transform_indices = @transform_2, window_bounds = array<i64: 1, 16>}, {transform_indices = @transform_3, window_bounds = array<i64: 1, 256, 16>}]} {
    %0 = tpu.iota {dimensions = array<i32: 0>} : vector<256x1xi32>
    %c15_i32 = arith.constant 15 : i32
    %1 = vector.broadcast %c15_i32 : i32 to vector<256x1xi32>
    %2 = arith.andi %0, %1 : vector<256x1xi32>
    %c0_i32 = arith.constant 0 : i32
    %3 = vector.broadcast %c0_i32 : i32 to vector<256x1xi32>
    %4 = arith.cmpi ne, %2, %3 : vector<256x1xi32>
    %c15_i32_0 = arith.constant 15 : i32
    %5 = vector.broadcast %c15_i32_0 : i32 to vector<256x1xi32>
    %6 = arith.cmpi ne, %2, %5 : vector<256x1xi32>
    %cst = arith.constant 0.000000e+00 : f32
    %7 = vector.broadcast %cst : f32 to vector<256x16xf32>
    %c0 = arith.constant 0 : index
    %c0_1 = arith.constant 0 : index
    %c0_2 = arith.constant 0 : index
    %8 = vector.load %arg2[%c0, %c0_1, %c0_2] : memref<1x256x16xbf16, #tpu.memory_space<vmem>>, vector<1x256x16xbf16>
    %9 = vector.shape_cast %8 : vector<1x256x16xbf16> to vector<256x16xbf16>
    %cst_3 = arith.constant 0.000000e+00 : bf16
    %10 = vector.broadcast %cst_3 : bf16 to vector<16x16xbf16>
    %cst_4 = arith.constant 0.000000e+00 : bf16
    %11 = vector.broadcast %cst_4 : bf16 to vector<16x16xbf16>
    %cst_5 = arith.constant 0.000000e+00 : bf16
    %12 = vector.broadcast %cst_5 : bf16 to vector<1x16xbf16>
    %13 = tpu.concatenate %12, %10, %9, %11, %12 in 0 : vector<1x16xbf16>, vector<16x16xbf16>, vector<256x16xbf16>, vector<16x16xbf16>, vector<1x16xbf16> -> vector<290x16xbf16>
    %14 = vector.extract_strided_slice %13 {offsets = [0, 0], sizes = [256, 16], strides = [1, 1]} : vector<290x16xbf16> to vector<256x16xbf16>
    %cst_6 = arith.constant 0.000000e+00 : bf16
    %15 = vector.broadcast %cst_6 : bf16 to vector<256x16xbf16>
    %16 = vector.shape_cast %4 : vector<256x1xi1> to vector<256x1xi1>
    %17 = vector.broadcast %16 : vector<256x1xi1> to vector<256x16xi1>
    %18 = arith.select %17, %14, %15 : vector<256x16xi1>, vector<256x16xbf16>
    %19 = vector.extract_strided_slice %13 {offsets = [1, 0], sizes = [256, 16], strides = [1, 1]} : vector<290x16xbf16> to vector<256x16xbf16>
    %20 = vector.extract_strided_slice %13 {offsets = [2, 0], sizes = [256, 16], strides = [1, 1]} : vector<290x16xbf16> to vector<256x16xbf16>
    %cst_7 = arith.constant 0.000000e+00 : bf16
    %21 = vector.broadcast %cst_7 : bf16 to vector<256x16xbf16>
    %22 = vector.shape_cast %6 : vector<256x1xi1> to vector<256x1xi1>
    %23 = vector.broadcast %22 : vector<256x1xi1> to vector<256x16xi1>
    %24 = arith.select %23, %20, %21 : vector<256x16xi1>, vector<256x16xbf16>
    %25 = tpu.concatenate %18, %19, %24 in 1 : vector<256x16xbf16>, vector<256x16xbf16>, vector<256x16xbf16> -> vector<256x48xbf16>
    %c0_8 = arith.constant 0 : index
    %c0_9 = arith.constant 0 : index
    %26 = vector.load %arg3[%c0_8, %c0_9] : memref<144x16xbf16, #tpu.memory_space<vmem>>, vector<48x16xbf16>
    %cst_10 = arith.constant dense<0.000000e+00> : vector<256x16xf32>
    %27 = tpu.matmul %25, %26, %cst_10 {dimension_numbers = #tpu.dot_dimension_numbers<[1], [0], [0], [1], [0, 0, 1, 1], [], []>} : vector<256x48xbf16>, vector<48x16xbf16>, vector<256x16xf32> -> vector<256x16xf32>
    %28 = arith.addf %7, %27 : vector<256x16xf32>
    %29 = vector.extract_strided_slice %13 {offsets = [16, 0], sizes = [256, 16], strides = [1, 1]} : vector<290x16xbf16> to vector<256x16xbf16>
    %cst_11 = arith.constant 0.000000e+00 : bf16
    %30 = vector.broadcast %cst_11 : bf16 to vector<256x16xbf16>
    %31 = vector.shape_cast %4 : vector<256x1xi1> to vector<256x1xi1>
    %32 = vector.broadcast %31 : vector<256x1xi1> to vector<256x16xi1>
    %33 = arith.select %32, %29, %30 : vector<256x16xi1>, vector<256x16xbf16>
    %34 = vector.extract_strided_slice %13 {offsets = [17, 0], sizes = [256, 16], strides = [1, 1]} : vector<290x16xbf16> to vector<256x16xbf16>
    %35 = vector.extract_strided_slice %13 {offsets = [18, 0], sizes = [256, 16], strides = [1, 1]} : vector<290x16xbf16> to vector<256x16xbf16>
    %cst_12 = arith.constant 0.000000e+00 : bf16
    %36 = vector.broadcast %cst_12 : bf16 to vector<256x16xbf16>
    %37 = vector.shape_cast %6 : vector<256x1xi1> to vector<256x1xi1>
    %38 = vector.broadcast %37 : vector<256x1xi1> to vector<256x16xi1>
    %39 = arith.select %38, %35, %36 : vector<256x16xi1>, vector<256x16xbf16>
    %40 = tpu.concatenate %33, %34, %39 in 1 : vector<256x16xbf16>, vector<256x16xbf16>, vector<256x16xbf16> -> vector<256x48xbf16>
    %c48 = arith.constant 48 : index
    %c0_13 = arith.constant 0 : index
    %41 = vector.load %arg3[%c48, %c0_13] : memref<144x16xbf16, #tpu.memory_space<vmem>>, vector<48x16xbf16>
    %cst_14 = arith.constant dense<0.000000e+00> : vector<256x16xf32>
    %42 = tpu.matmul %40, %41, %cst_14 {dimension_numbers = #tpu.dot_dimension_numbers<[1], [0], [0], [1], [0, 0, 1, 1], [], []>} : vector<256x48xbf16>, vector<48x16xbf16>, vector<256x16xf32> -> vector<256x16xf32>
    %43 = arith.addf %28, %42 : vector<256x16xf32>
    %44 = vector.extract_strided_slice %13 {offsets = [32, 0], sizes = [256, 16], strides = [1, 1]} : vector<290x16xbf16> to vector<256x16xbf16>
    %cst_15 = arith.constant 0.000000e+00 : bf16
    %45 = vector.broadcast %cst_15 : bf16 to vector<256x16xbf16>
    %46 = vector.shape_cast %4 : vector<256x1xi1> to vector<256x1xi1>
    %47 = vector.broadcast %46 : vector<256x1xi1> to vector<256x16xi1>
    %48 = arith.select %47, %44, %45 : vector<256x16xi1>, vector<256x16xbf16>
    %49 = vector.extract_strided_slice %13 {offsets = [33, 0], sizes = [256, 16], strides = [1, 1]} : vector<290x16xbf16> to vector<256x16xbf16>
    %50 = vector.extract_strided_slice %13 {offsets = [34, 0], sizes = [256, 16], strides = [1, 1]} : vector<290x16xbf16> to vector<256x16xbf16>
    %cst_16 = arith.constant 0.000000e+00 : bf16
    %51 = vector.broadcast %cst_16 : bf16 to vector<256x16xbf16>
    %52 = vector.shape_cast %6 : vector<256x1xi1> to vector<256x1xi1>
    %53 = vector.broadcast %52 : vector<256x1xi1> to vector<256x16xi1>
    %54 = arith.select %53, %50, %51 : vector<256x16xi1>, vector<256x16xbf16>
    %55 = tpu.concatenate %48, %49, %54 in 1 : vector<256x16xbf16>, vector<256x16xbf16>, vector<256x16xbf16> -> vector<256x48xbf16>
    %c96 = arith.constant 96 : index
    %c0_17 = arith.constant 0 : index
    %56 = vector.load %arg3[%c96, %c0_17] : memref<144x16xbf16, #tpu.memory_space<vmem>>, vector<48x16xbf16>
    %cst_18 = arith.constant dense<0.000000e+00> : vector<256x16xf32>
    %57 = tpu.matmul %55, %56, %cst_18 {dimension_numbers = #tpu.dot_dimension_numbers<[1], [0], [0], [1], [0, 0, 1, 1], [], []>} : vector<256x48xbf16>, vector<48x16xbf16>, vector<256x16xf32> -> vector<256x16xf32>
    %58 = arith.addf %43, %57 : vector<256x16xf32>
    %c0_19 = arith.constant 0 : index
    %c0_20 = arith.constant 0 : index
    %59 = vector.load %arg4[%c0_19, %c0_20] : memref<1x16xf32, #tpu.memory_space<vmem>>, vector<1x16xf32>
    %60 = vector.broadcast %59 : vector<1x16xf32> to vector<256x16xf32>
    %61 = arith.addf %58, %60 : vector<256x16xf32>
    %cst_21 = arith.constant 0.000000e+00 : f32
    %62 = vector.broadcast %cst_21 : f32 to vector<256x16xf32>
    %63 = arith.cmpf oge, %61, %62 : vector<256x16xf32>
    %cst_22 = arith.constant 2.000000e-01 : f32
    %64 = vector.broadcast %cst_22 : f32 to vector<256x16xf32>
    %65 = arith.mulf %64, %61 : vector<256x16xf32>
    %66 = arith.select %63, %61, %65 : vector<256x16xi1>, vector<256x16xf32>
    %c0_23 = arith.constant 0 : index
    %c0_24 = arith.constant 0 : index
    %c0_25 = arith.constant 0 : index
    %67 = vector.load %arg5[%c0_23, %c0_24, %c0_25] : memref<1x256x16xf32, #tpu.memory_space<vmem>>, vector<1x256x16xf32>
    %68 = vector.shape_cast %67 : vector<1x256x16xf32> to vector<256x16xf32>
    %69 = vector.shape_cast %66 : vector<256x16xf32> to vector<1x256x16xf32>
    tpu.vector_store %arg5[%c0_23, %c0_24, %c0_25], %69 {strides = array<i32>} : memref<1x256x16xf32, #tpu.memory_space<vmem>>, vector<1x256x16xf32>,
    return
  }
  func.func @transform_0(%arg0: i32, %arg1: i32) -> (i32, i32, i32) {
    %c0_i32 = arith.constant 0 : i32
    %c0_i32_0 = arith.constant 0 : i32
    %c0_i32_1 = arith.constant 0 : i32
    return %arg0, %c0_i32, %c0_i32_0 : i32, i32, i32
  }
  func.func @transform_1(%arg0: i32, %arg1: i32) -> (i32, i32) {
    %c0_i32 = arith.constant 0 : i32
    %c0_i32_0 = arith.constant 0 : i32
    %c0_i32_1 = arith.constant 0 : i32
    return %c0_i32, %c0_i32_0 : i32, i32
  }
  func.func @transform_2(%arg0: i32, %arg1: i32) -> (i32, i32) {
    %c0_i32 = arith.constant 0 : i32
    %c0_i32_0 = arith.constant 0 : i32
    %c0_i32_1 = arith.constant 0 : i32
    return %c0_i32, %c0_i32_0 : i32, i32
  }
  func.func @transform_3(%arg0: i32, %arg1: i32) -> (i32, i32, i32) {
    %c0_i32 = arith.constant 0 : i32
    %c0_i32_0 = arith.constant 0 : i32
    return %arg0, %arg1, %c0_i32 : i32, i32, i32
  }
}

</mosaic_0001>

<bundles_post_ra>
// kernel: tpu_custom_call.1
= control target key start
LH: loop header
LB: loop body
LE: loop exit
PB: predicated region body
PF: predicated region fallthrough
CT: control target
= control target key end

     0   :  { %s2951_s12 = smov 0   ;;  %s2953_s13 = smov 0   ;;  %s4678_s0 = inlined_call_operand.vmem [shape: bf16[2,256,16], index: 0, kind: input, shape index: {}]   ;;  %s4679_s1 = inlined_call_operand.vmem [shape: bf16[144,16], index: 1, kind: input, shape index: {}]   ;;  %s4680_s2 = inlined_call_operand.vmem [shape: f32[1,16], index: 2, kind: input, shape index: {}]   ;;  %s4681_s3 = inlined_call_operand.vmem [shape: f32[2,256,16], index: 3, kind: output, shape index: {}]  }
   0x1   :  { %s2955_s14 = smov 0  }
   0x2 LB: > { %s25_s15 = sadd.s32 1, %s2921_s13  ;;  %p2651_p0 = scmp.ge.s32.totalorder %s2925_s14, 1  ;;  %s2925_s14 = sphi %s2955_s14, %s13_s14   ;;  %s2921_s13 = sphi %s2953_s13, %s4900_s13   ;;  %s2917_s12 = sphi %s2951_s12, %s4899_s12  }
   0x3   : > { %p27_p1 = scmp.ge.s32.totalorder %s25_s15, 2  ;;  %p151_p2 = scmp.lt.s32.totalorder %s2925_s14, 3 }
   0x5   : > { %s4902_s15 = smov (%p27_p1, %s25_s15), 0  ;;  %p152_p3 = pnand %p2651_p0, %p151_p2 }
   0x7   : > { %155 = sbr.rel (%p152_p3) target bundleno = 498 (0x1f2), region = 32 }
   0xc   : > { %p179_p4 = scmp.lt.s32.totalorder %s2917_s12, 1  ;;  %v197_v0 = vlaneseq  ;;  %vm2927_vm0 = vmmov 1   ;;  %vm438_vm2 = vsmask.f32 256  ;;  %vm4685_vm3 = vcmask 1040384   ;;  %s2929_s20 = smov 16  }
   0xd   : > { %vm652_vm1 = vmpackc.low %vm2927_vm0, %vm2927_vm0  ;;  %v2928_v2 = vmov 0   ;;  %vm4694_vm4 = vsmask.f32 7424  ;;  %vm4695_vm12 = vcmask 1046528   ;;  %s2930_s21 = smov 32  }
   0xe   : > { %s4904_s12 = smov (!%p179_p4, %s2917_s12), 1  ;;  %v2971_v1 = vshrl.u32 %v197_v0, 7  ;;  %v2974_v3 = vrot.slane %v2928_v2, 1  ;;  %v682_v7 = vsel %vm652_vm1, 65537, %v2928_v2  ;;  %v2987_v8 = vunpack.c.l.b16 %v2928_v2  ;;  %vm3016_vm5 = vmand %vm4685_vm3, %vm438_vm2 }
   0xf   : > { %s2838_s16 = sshll.u32 %s4904_s12, 7  ;;  %v3002_v18 = vunpack.c.h.b16 %v2928_v2  ;;  %v3008_v21 = vunpack.c.l.b16 %v682_v7 }
  0x10   : > { %v221_v4 = vadd.s32 184, %v2971_v1  ;;  %v223_v5 = vadd.s32 200, %v2971_v1  ;;  %v225_v6 = vadd.s32 216, %v2971_v1  ;;  %s2984_s19 = scalar_lea.vmem %s4678_s0, %s2838_s16  ;;  %v2990_v9 = vadd.s32 8, %v2971_v1 }
  0x11   : > { %v2993_v10 = vadd.s32 24, %v2971_v1  ;;  %v2996_v11 = vadd.s32 40, %v2971_v1  ;;  %v2840_v12 = vld [vmem:[%s2984_s19] sm:$0xff]  ;;  %v2841_v13 = vld [vmem:[%s2984_s19 + $0x8] sm:$0xff]  ;;  %v2842_v14 = vld [vmem:[%s2984_s19 + $0x10] sm:$0xff] }
  0x12   : > { %v253_v15 = vand.u32 15, %v221_v4  ;;  %v255_v16 = vand.u32 15, %v223_v5  ;;  %v257_v17 = vand.u32 15, %v225_v6  ;;  %v3005_v19 = vld [vmem:[%s2984_s19 + $0x58] sm:$0xff]  ;;  %v2852_v20 = vld [vmem:[%s2984_s19 + $0x60] sm:$0xff]  ;;  %v231_v22 = vand.u32 15, %v2990_v9 }
  0x13   : > { %v233_v23 = vand.u32 15, %v2993_v10  ;;  %v235_v24 = vand.u32 15, %v2996_v11  ;;  %v440_v25 = vshrl.u32 %v2840_v12, 16  ;;  %v443_v26 = vshll.u32 %v2840_v12, 16  ;;  %v2853_v29 = vld [vmem:[%s2984_s19 + $0x68] sm:$0xff] }
  0x14   : > { %v447_v27 = vshrl.u32 %v2841_v13, 16  ;;  %v450_v28 = vshll.u32 %v2841_v13, 16  ;;  %v455_v31 = vshrl.u32 %v2842_v14, 16  ;;  %v458_v32 = vshll.u32 %v2842_v14, 16 }
  0x15   : > { %vm3020_vm6 = vcmp.ne.s32.totalorder %v253_v15, 15  ;;  %vm3024_vm7 = vcmp.ne.s32.totalorder %v255_v16, 15  ;;  %v442_v35 = vrot.slane %v440_v25, 7  ;;  %vm3028_vm8 = vcmp.ne.s32.totalorder %v257_v17, 15 }
  0x16   : > { %v449_v36 = vrot.slane %v447_v27, 7  ;;  %v527_v38 = vshrl.u32 %v3005_v19, 16  ;;  %vm963_vm9 = vmpackc.low %vm3020_vm6, %vm3020_vm6  ;;  %v3036_v39 = vrot.slane %v455_v31, 7  ;;  %v530_v40 = vshll.u32 %v3005_v19, 16  ;;  %v2843_v19 = vld [vmem:[%s2984_s19 + $0x18] sm:$0xff] }
  0x17   : > { %v535_v41 = vshrl.u32 %v2852_v20, 16  ;;  %v538_v42 = vshll.u32 %v2852_v20, 16  ;;  %vm965_vm10 = vmpackc.low %vm3024_vm7, %vm3024_vm7  ;;  %v445_v43 = vor.u32 %v443_v26, %v442_v35  ;;  %v543_v46 = vshrl.u32 %v2853_v29, 16 }
  0x18   : > { %v452_v44 = vor.u32 %v450_v28, %v449_v36  ;;  %v529_v45 = vrot.slane %v527_v38, 7  ;;  %v460_v47 = vor.u32 %v458_v32, %v3036_v39  ;;  %v546_v49 = vshll.u32 %v2853_v29, 16  ;;  %vm967_vm11 = vmpackc.low %vm3028_vm8, %vm3028_vm8 }
  0x19   : > { %v537_v48 = vrot.slane %v535_v41, 7  ;;  %v995_v50 = vsel %vm963_vm9, 65537, %v2928_v2  ;;  %v3049_v51 = vsel %vm3016_vm5, 0, %v445_v43  ;;  %v3054_v53 = vrot.slane %v543_v46, 7 }
  0x1a   : > { %v3052_v52 = vsel %vm438_vm2, %v442_v35, %v452_v44  ;;  %v997_v54 = vsel %vm965_vm10, 65537, %v2928_v2  ;;  %v1220_v55 = vshll.u32 %v3049_v51, 16  ;;  %v3059_v56 = vsel %vm438_vm2, %v449_v36, %v460_v47 }
  0x1b   : > { %v1228_v57 = vshll.u32 %v3052_v52, 16  ;;  %v1232_v58 = vshrl.u32 %v3052_v52, 16  ;;  %v1236_v59 = vshll.u32 %v3059_v56, 16  ;;  %v540_v60 = vor.u32 %v538_v42, %v537_v48 }
  0x1c   : > { %v548_v61 = vor.u32 %v546_v49, %v3054_v53  ;;  %v999_v62 = vsel %vm967_vm11, 65537, %v2928_v2  ;;  %v1222_v63 = vrot.slane %v1220_v55, 1  ;;  %v1027_v4 = vunpack.c.l.b16 %v995_v50 }
  0x1d   : > { %v1230_v0 = vrot.slane %v1228_v57, 1  ;;  %v1029_v5 = vunpack.c.l.b16 %v997_v54  ;;  %v3066_v6 = vrot.slane %v1236_v59, 1  ;;  %v3069_v7 = vsel %vm438_vm2, %v529_v45, %v540_v60  ;;  %v2854_v54 = vld [vmem:[%s2984_s19 + $0x70] sm:$0xff] }
  0x1e   : > { %v3072_v12 = vsel %vm438_vm2, %v537_v48, %v548_v61  ;;  %v1031_v13 = vunpack.c.l.b16 %v999_v62  ;;  %v1223_v14 = vsel %vm4694_vm4, %v2974_v3, %v1222_v63  ;;  %v3077_v16 = vpack.c.b16 %v1027_v4, %v3008_v21 }
  0x1f   : > { %v1234_v15 = vor.u32 %v1232_v58, %v1230_v0  ;;  %v1048_v17 = vpack.c.b16 %v1029_v5, %v3008_v21  ;;  %1344 = vrot.lane.b32.xlu2 %v1223_v14, %s2929_s20  ;;  %v3085_v25 = vor.u32 %v530_v40, %v529_v45  ;;  %v1224_v26 = vshrl.u32 %v3049_v51, 16 }
  0x20   : > { %v3083_v20 = vpack.c.b16 %v1031_v13, %v3008_v21  ;;  %v1316_v27 = vshll.u32 %v3069_v7, 16  ;;  %v4683_v29 = vrot.slane %v3077_v16, 7  ;;  %v1320_v32 = vshrl.u32 %v3069_v7, 16 }
  0x21   : > { %v1239_v28 = vsel %vm4694_vm4, %v1234_v15, %v3066_v6  ;;  %v1075_v31 = vrot.slane %v1048_v17, 7  ;;  %v1226_v34 = vor.u32 %v1224_v26, %v1222_v63  ;;  %v1324_v36 = vshll.u32 %v3072_v12, 16 }
  0x22   : > { %1348 = vrot.lane.b32.xlu0 %v1239_v28, %s2929_s20  ;;  %v1077_v33 = vrot.slane %v3083_v20, 7  ;;  %v3095_v35 = vrot.slane %v1316_v27, 1  ;;  %vm3103_vm13 = vcmp.ne.s32.totalorder %v231_v22, 15  ;;  %vm3109_vm14 = vcmp.ne.s32.totalorder %v233_v23, 15 }
  0x23   : > { %v1076_v37 = vsel %vm4685_vm3, %v4683_v29, %v1075_v31  ;;  %v463_v41 = vshrl.u32 %v2843_v19, 16  ;;  %v1231_v45 = vsel %vm4694_vm4, %v1226_v34, %v1230_v0  ;;  %vm941_vm15 = vmpackc.low %vm3103_vm13, %vm3103_vm13  ;;  %v3121_v23 = vrot.slane %v1324_v36, 1 }
  0x24   : > { %v1078_v42 = vsel %vm4685_vm3, %v1075_v31, %v1077_v33  ;;  %v1160_v43 = vunpack.c.l.b16 %v1076_v37  ;;  %v1161_v44 = vunpack.c.h.b16 %v1076_v37  ;;  %v1322_v22 = vor.u32 %v1320_v32, %v3095_v35  ;;  %vm943_vm0 = vmpackc.low %vm3109_vm14, %vm3109_vm14 }
  0x25   : > { %v1167_v9 = vunpack.c.l.b16 %v1078_v42  ;;  %v1168_v10 = vunpack.c.h.b16 %v1078_v42  ;;  %v973_v46 = vsel %vm941_vm15, 65537, %v2928_v2  ;;  %v975_v47 = vsel %vm943_vm0, 65537, %v2928_v2 }
  0x26   : > { %vm1164_vm1 = vcmp.ne.s32.totalorder %v1160_v43, %v2987_v8  ;;  %vm1165_vm6 = vcmp.ne.s32.totalorder %v1161_v44, %v3002_v18  ;;  %v1327_v49 = vsel %vm4694_vm4, %v1322_v22, %v3121_v23  ;;  %v1005_v50 = vunpack.c.l.b16 %v973_v46 }
  0x27   : > { %vm3130_vm7 = vmpackc.low %vm1165_vm6, %vm1164_vm1  ;;  %vm1171_vm8 = vcmp.ne.s32.totalorder %v1167_v9, %v2987_v8  ;;  %vm1172_vm9 = vcmp.ne.s32.totalorder %v1168_v10, %v3002_v18  ;;  %1346 = vrot.lane.b32.xlu2 %v1231_v45, %s2929_s20  ;;  %v1007_v58 = vunpack.c.l.b16 %v975_v47  ;;  %v3147_v59 = vrot.slane %v463_v41, 7 }
  0x28   : > { %vm3139_vm10 = vmpackc.low %vm1172_vm9, %vm1171_vm8  ;;  %v1595_v57 = vsel %vm3130_vm7, %v3069_v7, 0  ;;  %v466_v60 = vshll.u32 %v2843_v19, 16  ;;  %v1036_v63 = vpack.c.b16 %v1005_v50, %v3008_v21  ;;  %v1240_v0 = vshrl.u32 %v3059_v56, 16  ;;  %v2844_v50 = vld [vmem:[%s2984_s19 + $0x20] sm:$0xff] }
  0x29   : > { %v1596_v61 = vsel %vm3139_vm10, %v3072_v12, 0  ;;  %v3152_v62 = vrot.slane %v1595_v57, 1  ;;  %v1037_v5 = vpack.c.b16 %v1007_v58, %v3008_v21  ;;  %vm299_vm11 = vcmp.ne.s32.totalorder %v235_v24, 15 }
  0x2a   : > { %v3156_v4 = vrot.slane %v1596_v61, 1  ;;  %1370 = vrot.lane.b32.xlu0 %v1327_v49, %s2929_s20  ;;  %v468_v13 = vor.u32 %v466_v60, %v3147_v59  ;;  %v1052_v14 = vrot.slane %v1036_v63, 7  ;;  %vm945_vm13 = vmpackc.low %vm299_vm11, %vm299_vm11  ;;  %v551_v15 = vshrl.u32 %v2854_v54, 16 }
  0x2b   : > { %v554_v17 = vshll.u32 %v2854_v54, 16  ;;  %v227_v19 = vadd.s32 232, %v2971_v1  ;;  %v1053_v27 = vrot.slane %v1037_v5, 7  ;;  %v977_v31 = vsel %vm945_vm13, 65537, %v2928_v2 }
  0x2c   : > { %v1653_v26 = vsel %vm4695_vm12, %v3152_v62, %v3156_v4  ;;  %v3169_v28 = vsel %vm438_vm2, %v3036_v39, %v468_v13  ;;  %v1576_v11 = vunpack.c.l.b16 %v1052_v14  ;;  %v1577_v24 = vunpack.c.h.b16 %v1052_v14 }
  0x2d   : > { %1684 = vrot.lane.b32.xlu1 %v1653_v26, %s2930_s21  ;;  %v1244_v32 = vshll.u32 %v3169_v28, 16  ;;  %v1009_v34 = vunpack.c.l.b16 %v977_v31  ;;  %v1054_v36 = vsel %vm4685_vm3, %v1052_v14, %v1053_v27  ;;  %v1242_v37 = vor.u32 %v1240_v0, %v3066_v6  ;;  %v2855_v31 = vld [vmem:[%s2984_s19 + $0x78] sm:$0xff] }
  0x2e   : > { %v3176_v38 = vrot.slane %v551_v15, 7  ;;  %v1328_v40 = vshrl.u32 %v3072_v12, 16  ;;  %v1083_v39 = vunpack.c.l.b16 %v1054_v36  ;;  %v1084_v41 = vunpack.c.h.b16 %v1054_v36 }
  0x2f   : > { %vm1580_vm14 = vcmp.ne.s32.totalorder %v1576_v11, %v2987_v8  ;;  %vm1581_vm15 = vcmp.ne.s32.totalorder %v1577_v24, %v3002_v18  ;;  %v1246_v42 = vrot.slane %v1244_v32, 1  ;;  %v3182_v43 = vpack.c.b16 %v1009_v34, %v3008_v21 }
  0x30   : > { %vm1582_vm0 = vmpackc.low %vm1581_vm15, %vm1580_vm14  ;;  %v556_v44 = vor.u32 %v554_v17, %v3176_v38  ;;  %v259_v45 = vand.u32 15, %v227_v19  ;;  %vm1087_vm1 = vcmp.ne.s32.totalorder %v1083_v39, %v2987_v8  ;;  %vm1088_vm6 = vcmp.ne.s32.totalorder %v1084_v41, %v3002_v18 }
  0x31   : > { %v2058_v6 = vsel %vm1582_vm0, %v3052_v52, 0  ;;  %v1583_v9 = vsel %vm1582_vm0, %v3049_v51, 0  ;;  %vm3189_vm8 = vmpackc.low %vm1088_vm6, %vm1087_vm1  ;;  %v1247_v46 = vsel %vm4694_vm4, %v1242_v37, %v1246_v42  ;;  %v1055_v47 = vrot.slane %v3182_v43, 7 }
  0x32   : > { %v2096_v22 = vrot.slane %v2058_v6, 1  ;;  %v1330_v49 = vor.u32 %v1328_v40, %v3121_v23  ;;  %v2059_v54 = vsel %vm3189_vm8, %v3059_v56, 0  ;;  %1350 = vrot.lane.b32.xlu2 %v1247_v46, %s2929_s20  ;;  %v1195_v57 = vsel %vm3189_vm8, %v3049_v51, 0 }
  0x33   : > { %v1584_v58 = vsel %vm3189_vm8, %v3052_v52, 0  ;;  %v3209_v60 = vsel %vm438_vm2, %v3054_v53, %v556_v44  ;;  %v2097_v23 = vrot.slane %v2059_v54, 1  ;;  %v1395_v61 = vrot.slane %v1195_v57, 1 }
  0x34   : > { %v1627_v63 = vrot.slane %v1583_v9, 1  ;;  %v1056_v0 = vsel %vm4685_vm3, %v1053_v27, %v1055_v47  ;;  %v1332_v14 = vshll.u32 %v3209_v60, 16  ;;  %vm323_vm9 = vcmp.ne.s32.totalorder %v259_v45, 15 }
  0x35   : > { %v1090_v5 = vunpack.c.l.b16 %v1056_v0  ;;  %v1091_v13 = vunpack.c.h.b16 %v1056_v0  ;;  %v2098_v15 = vsel %vm4695_vm12, %v2096_v22, %v2097_v23  ;;  %v1396_v17 = vsel %vm4695_vm12, %v2974_v3, %v1395_v61  ;;  %vm969_vm11 = vmpackc.low %vm323_vm9, %vm323_vm9 }
  0x36   : > { %v3218_v53 = vrot.slane %v1584_v58, 1  ;;  %v471_v19 = vshrl.u32 %v2844_v50, 16  ;;  %2128 = vrot.lane.b32.xlu1 %v2098_v15, %s2930_s21  ;;  %1427 = vrot.lane.b32.xlu0 %v1396_v17, %s2930_s21  ;;  %v3224_v26 = vrot.slane %v1332_v14, 1  ;;  %v1001_v27 = vsel %vm969_vm11, 65537, %v2928_v2  ;;  %v2845_v58 = vld [vmem:[%s2984_s19 + $0x28] sm:$0xff] }
  0x37   : > { %vm1094_vm13 = vcmp.ne.s32.totalorder %v1090_v5, %v2987_v8  ;;  %vm1095_vm14 = vcmp.ne.s32.totalorder %v1091_v13, %v3002_v18  ;;  %v1033_v24 = vunpack.c.l.b16 %v1001_v27  ;;  %v474_v34 = vshll.u32 %v2844_v50, 16 }
  0x38   : > { %vm3228_vm15 = vmpackc.low %vm1095_vm14, %vm1094_vm13  ;;  %v3232_v32 = vrot.slane %v471_v19, 7  ;;  %v1248_v37 = vshrl.u32 %v3169_v28, 16  ;;  %v1629_v39 = vsel %vm4695_vm12, %v1627_v63, %v3218_v53  ;;  %v1335_v6 = vsel %vm4694_vm4, %v1330_v49, %v3224_v26 }
  0x39   : > { %v2060_v36 = vsel %vm3228_vm15, %v3169_v28, 0  ;;  %v1196_v40 = vsel %vm3228_vm15, %v3052_v52, 0  ;;  %v3246_v44 = vpack.c.b16 %v1033_v24, %v3008_v21  ;;  %v205_v10 = vadd.s32 56, %v2971_v1 }
  0x3a   : > { %v3243_v41 = vrot.slane %v2060_v36, 1  ;;  %v476_v45 = vor.u32 %v474_v34, %v3232_v32  ;;  %v3251_v9 = vrot.slane %v1196_v40, 1  ;;  %v559_v22 = vshrl.u32 %v2855_v31, 16 }
  0x3b   : > { %v1079_v50 = vrot.slane %v3246_v44, 7  ;;  %v562_v57 = vshll.u32 %v2855_v31, 16  ;;  %v1250_v63 = vor.u32 %v1248_v37, %v1246_v42  ;;  %v237_v0 = vand.u32 15, %v205_v10 }
  0x3c   : > { %v2100_v46 = vsel %vm4695_vm12, %v2097_v23, %v3243_v41  ;;  %v3259_v54 = vsel %vm438_vm2, %v3147_v59, %v476_v45  ;;  %v1585_v5 = vsel %vm3228_vm15, %v3059_v56, 0  ;;  %v561_v59 = vrot.slane %v559_v22, 7 }
  0x3d   : > { %4717 = vst [vmem:[#allocation2_spill] sm:$0xff] %v3259_v54  ;;  %2130 = vrot.lane.b32.xlu2 %v2100_v46, %s2930_s21  ;;  %v1252_v49 = vshll.u32 %v3259_v54, 16  ;;  %v1080_v23 = vsel %vm4685_vm3, %v1077_v33, %v1079_v50  ;;  %v229_v13 = vadd.s32 248, %v2971_v1  ;;  %vm301_vm0 = vcmp.ne.s32.totalorder %v237_v0, 15 }
  0x3e   : > { %1660 = vrot.lane.b32.xlu1 %v1629_v39, %s2930_s21  ;;  %1372 = vrot.lane.b32.xlu0 %v1335_v6, %s2929_s20  ;;  %v1174_v42 = vunpack.c.l.b16 %v1080_v23  ;;  %v1175_v14 = vunpack.c.h.b16 %v1080_v23  ;;  %v1398_v20 = vsel %vm4695_vm12, %v1395_v61, %v3251_v9  ;;  %vm947_vm1 = vmpackc.low %vm301_vm0, %vm301_vm0  ;;  %v564_v33 = vor.u32 %v562_v57, %v561_v59 }
  0x3f   : > { %v3275_v15 = vrot.slane %v1252_v49, 1  ;;  %v261_v17 = vand.u32 15, %v229_v13  ;;  %v479_v19 = vshrl.u32 %v2845_v58, 16  ;;  %v979_v31 = vsel %vm947_vm1, 65537, %v2928_v2 }
  0x40   : > { %vm1178_vm6 = vcmp.ne.s32.totalorder %v1174_v42, %v2987_v8  ;;  %vm1179_vm8 = vcmp.ne.s32.totalorder %v1175_v14, %v3002_v18  ;;  %v1011_v24 = vunpack.c.l.b16 %v979_v31  ;;  %v3290_v61 = vsel %vm438_vm2, %v3176_v38, %v564_v33 }
  0x41   : > { %v1255_v27 = vsel %vm4694_vm4, %v1250_v63, %v3275_v15  ;;  %vm3284_vm9 = vmpackc.low %vm1179_vm8, %vm1178_vm6  ;;  %vm325_vm11 = vcmp.ne.s32.totalorder %v261_v17, 15  ;;  %v3292_v34 = vrot.slane %v479_v19, 7  ;;  %v1336_v37 = vshrl.u32 %v3209_v60, 16 }
  0x42   : > { %v1597_v36 = vsel %vm3284_vm9, %v3209_v60, 0  ;;  %v1340_v40 = vshll.u32 %v3290_v61, 16  ;;  %vm971_vm13 = vmpackc.low %vm325_vm11, %vm325_vm11  ;;  %v482_v39 = vshll.u32 %v2845_v58, 16  ;;  %v1039_v6 = vpack.c.b16 %v1011_v24, %v3008_v21 }
  0x43   : > { %v3299_v45 = vrot.slane %v1597_v36, 1  ;;  %v1003_v38 = vsel %vm971_vm13, 65537, %v2928_v2  ;;  %v207_v10 = vadd.s32 72, %v2971_v1  ;;  %v3305_v22 = vrot.slane %v1585_v5, 1 }
  0x44   : > { %v1035_v46 = vunpack.c.l.b16 %v1003_v38  ;;  %v1057_v63 = vrot.slane %v1039_v6, 7  ;;  %v484_v58 = vor.u32 %v482_v39, %v3292_v34  ;;  %v1338_v5 = vor.u32 %v1336_v37, %v3224_v26  ;;  %v2846_v26 = vld [vmem:[%s2984_s19 + $0x30] sm:$0xff] }
  0x45   : > { %1352 = vrot.lane.b32.xlu2 %v1255_v27, %s2929_s20  ;;  %v1655_v57 = vsel %vm4695_vm12, %v3156_v4, %v3299_v45  ;;  %v239_v49 = vand.u32 15, %v207_v10  ;;  %v3318_v13 = vrot.slane %v1340_v40, 1  ;;  %v1631_v33 = vsel %vm4695_vm12, %v3218_v53, %v3305_v22 }
  0x46   : > { %1686 = vrot.lane.b32.xlu1 %v1655_v57, %s2930_s21  ;;  %1429 = vrot.lane.b32.xlu0 %v1398_v20, %s2930_s21  ;;  %v1051_v0 = vpack.c.b16 %v1035_v46, %v3008_v21  ;;  %v1058_v23 = vsel %vm4685_vm3, %v1055_v47, %v1057_v63  ;;  %v3325_v20 = vsel %vm438_vm2, %v3232_v32, %v484_v58  ;;  %v1256_v43 = vshrl.u32 %v3259_v54, 16 }
  0x47   : > { %vm303_vm14 = vcmp.ne.s32.totalorder %v239_v49, 15  ;;  %v1097_v4 = vunpack.c.l.b16 %v1058_v23  ;;  %v1098_v42 = vunpack.c.h.b16 %v1058_v23  ;;  %4720 = vst [vmem:[#allocation3_spill] sm:$0xff] %v3325_v20  ;;  %v1343_v32 = vsel %vm4694_vm4, %v1338_v5, %v3318_v13 }
  0x48   : > { %v1081_v14 = vrot.slane %v1051_v0, 7  ;;  %vm949_vm15 = vmpackc.low %vm303_vm14, %vm303_vm14  ;;  %v3343_v24 = vsel %vm3016_vm5, %v561_v59, 0  ;;  %v487_v30 = vshrl.u32 %v2846_v26, 16  ;;  %v4723_v59 = vmov 0 }
  0x49   : > { %v981_v47 = vsel %vm949_vm15, 65537, %v2928_v2  ;;  %vm1101_vm0 = vcmp.ne.s32.totalorder %v1097_v4, %v2987_v8  ;;  %vm1102_vm1 = vcmp.ne.s32.totalorder %v1098_v42, %v3002_v18  ;;  %v1258_v57 = vor.u32 %v1256_v43, %v3275_v15 }
  0x4a   : > { %v1082_v17 = vsel %vm4685_vm3, %v1079_v50, %v1081_v14  ;;  %v1013_v19 = vunpack.c.l.b16 %v981_v47  ;;  %vm3335_vm6 = vmpackc.low %vm1102_vm1, %vm1101_vm0  ;;  %v1260_v50 = vshll.u32 %v3325_v20, 16  ;;  %v1188_v6 = vunpack.c.l.b16 %v1081_v14 }
  0x4b   : > { %v1181_v27 = vunpack.c.l.b16 %v1082_v17  ;;  %v1182_v31 = vunpack.c.h.b16 %v1082_v17  ;;  %v2061_v44 = vsel %vm3335_vm6, %v3259_v54, 0  ;;  %v1197_v36 = vsel %vm3335_vm6, %v3059_v56, 0 }
  0x4c   : > { %v3353_v37 = vpack.c.b16 %v1013_v19, %v3008_v21  ;;  %v3355_v40 = vrot.slane %v2061_v44, 1  ;;  %v1189_v38 = vunpack.c.h.b16 %v1081_v14  ;;  %v3373_v58 = vrot.slane %v1197_v36, 1 }
  0x4d   : > { %vm1185_vm8 = vcmp.ne.s32.totalorder %v1181_v27, %v2987_v8  ;;  %vm1186_vm5 = vcmp.ne.s32.totalorder %v1182_v31, %v3002_v18  ;;  %v1600_v23 = vshrl.u32 %v3290_v61, 16  ;;  %v1604_v5 = vshll.u32 %v3343_v24, 16 }
  0x4e   : > { %1662 = vrot.lane.b32.xlu1 %v1631_v33, %s2930_s21  ;;  %1374 = vrot.lane.b32.xlu0 %v1343_v32, %s2929_s20  ;;  %vm3361_vm11 = vmpackc.low %vm1186_vm5, %vm1185_vm8  ;;  %v1059_v39 = vrot.slane %v3353_v37, 7  ;;  %v2102_v10 = vsel %vm4695_vm12, %v3243_v41, %v3355_v40  ;;  %v3382_v41 = vld [vmem:[%s2984_s19 + $0x50] sm:$0xff]  ;;  %v1262_v4 = vrot.slane %v1260_v50, 1  ;;  %v3384_v33 = vrot.slane %v487_v30, 7 }
  0x4f   : > { %v4724_v59 = vsel %vm3361_vm11, 4294967295, %v4723_v59  ;;  %v1598_v46 = vsel %vm3361_vm11, %v3290_v61, 0  ;;  %2132 = vrot.lane.b32.xlu2 %v2102_v10, %s2930_s21  ;;  %vm3387_vm13 = vcmp.ne.s32.totalorder %v1188_v6, %v2987_v8  ;;  %vm3392_vm14 = vcmp.ne.s32.totalorder %v1189_v38, %v3002_v18 }
  0x50   : > { %v1656_v49 = vrot.slane %v1598_v46, 1  ;;  %v1060_v0 = vsel %vm4685_vm3, %v1057_v63, %v1059_v39  ;;  %v490_v63 = vshll.u32 %v2846_v26, 16  ;;  %v209_v47 = vadd.s32 88, %v2971_v1  ;;  %vm4682_vm8 = vmpackc.low %vm3392_vm14, %vm3387_vm13 }
  0x51   : > { %v1104_v42 = vunpack.c.l.b16 %v1060_v0  ;;  %v1105_v14 = vunpack.c.h.b16 %v1060_v0  ;;  %v1400_v19 = vsel %vm4695_vm12, %v3251_v9, %v3373_v58  ;;  %v1586_v32 = vsel %vm3335_vm6, %v3169_v28, 0  ;;  %v2847_v0 = vld [vmem:[%s2984_s19 + $0x38] sm:$0xff] }
  0x52   : > { %v1657_v17 = vsel %vm4695_vm12, %v3299_v45, %v1656_v49  ;;  %v241_v26 = vand.u32 15, %v209_v47  ;;  %v519_v31 = vshrl.u32 %v3382_v41, 16  ;;  %v1263_v45 = vsel %vm4694_vm4, %v1258_v57, %v1262_v4 }
  0x53   : > { %vm1108_vm15 = vcmp.ne.s32.totalorder %v1104_v42, %v2987_v8  ;;  %vm1109_vm0 = vcmp.ne.s32.totalorder %v1105_v14, %v3002_v18  ;;  %v492_v53 = vor.u32 %v490_v63, %v3384_v33  ;;  %v3423_v44 = vrot.slane %v1586_v32, 1 }
  0x54   : > { %vm3407_vm1 = vmpackc.low %vm1109_vm0, %vm1108_vm15  ;;  %v1602_v50 = vor.u32 %v1600_v23, %v3318_v13  ;;  %v3426_v36 = vrot.slane %v1604_v5, 1  ;;  %vm305_vm6 = vcmp.ne.s32.totalorder %v241_v26, 15  ;;  %v1599_v30 = vsel %vm4682_vm8, %v3343_v24, 0 }
  0x55   : > { %v2062_v9 = vsel %vm3407_vm1, %v3325_v20, 0  ;;  %vm951_vm5 = vmpackc.low %vm305_vm6, %vm305_vm6  ;;  %v3435_v6 = vrot.slane %v519_v31, 7  ;;  %v3442_v13 = vsel %vm438_vm2, %v3292_v34, %v492_v53  ;;  %v1198_v46 = vsel %vm3407_vm1, %v3169_v28, 0 }
  0x56   : > { %1688 = vrot.lane.b32.xlu1 %v1657_v17, %s2930_s21  ;;  %1431 = vrot.lane.b32.xlu0 %v1400_v19, %s2930_s21  ;;  %v3437_v38 = vrot.slane %v2062_v9, 1  ;;  %v983_v10 = vsel %vm951_vm5, 65537, %v2928_v2  ;;  %4731 = vst [vmem:[#allocation4_spill] sm:$0xff] %v3442_v13  ;;  %v1633_v23 = vsel %vm4695_vm12, %v3305_v22, %v3423_v44  ;;  %v1607_v5 = vsel %vm4694_vm4, %v1602_v50, %v3426_v36 }
  0x57   : > { %1354 = vrot.lane.b32.xlu2 %v1263_v45, %s2929_s20  ;;  %v1015_v57 = vunpack.c.l.b16 %v983_v10  ;;  %v1658_v42 = vrot.slane %v1599_v30, 1  ;;  %v1264_v14 = vshrl.u32 %v3325_v20, 16  ;;  %v3458_v34 = vsel %vm438_vm2, %v3435_v6, %v3085_v25 }
  0x58   : > { %v211_v47 = vadd.s32 104, %v2971_v1  ;;  %v213_v17 = vadd.s32 120, %v2971_v1  ;;  %v2104_v22 = vsel %vm4695_vm12, %v3355_v40, %v3437_v38  ;;  %v1268_v19 = vshll.u32 %v3442_v13, 16 }
  0x59   : > { %v1041_v63 = vpack.c.b16 %v1015_v57, %v3008_v21  ;;  %v3466_v32 = vrot.slane %v1198_v46, 1  ;;  %v495_v31 = vshrl.u32 %v2847_v0, 16  ;;  %v1266_v45 = vor.u32 %v1264_v14, %v1262_v4 }
  0x5a   : > { %v243_v25 = vand.u32 15, %v211_v47  ;;  %v1308_v9 = vshll.u32 %v3458_v34, 16  ;;  %v1659_v53 = vsel %vm4695_vm12, %v1656_v49, %v1658_v42  ;;  %v245_v50 = vand.u32 15, %v213_v17 }
  0x5b   : > { %v1061_v26 = vrot.slane %v1041_v63, 7  ;;  %v1270_v30 = vrot.slane %v1268_v19, 1  ;;  %v1402_v10 = vsel %vm4695_vm12, %v3373_v58, %v3466_v32  ;;  %v1312_v4 = vshrl.u32 %v3458_v34, 16 }
  0x5c   : > { %vm307_vm15 = vcmp.ne.s32.totalorder %v243_v25, 15  ;;  %v3485_v37 = vrot.slane %v1308_v9, 1  ;;  %v1587_v58 = vsel %vm3407_vm1, %v3259_v54, 0 }
  0x5d   : > { %v1062_v40 = vsel %vm4685_vm3, %v1059_v39, %v1061_v26  ;;  %vm953_vm0 = vmpackc.low %vm307_vm15, %vm307_vm15  ;;  %vm3494_vm15 = vcmp.ne.s32.totalorder %v245_v50, 15  ;;  %v3508_v17 = vrot.slane %v1587_v58, 1  ;;  %v1207_v50 = vsel %vm3139_vm10, %v3069_v7, 0 }
  0x5e   : > { %1664 = vrot.lane.b32.xlu1 %v1633_v23, %s2930_s21  ;;  %1608 = vrot.lane.b32.xlu0 %v1607_v5, %s2929_s20  ;;  %v1111_v46 = vunpack.c.l.b16 %v1062_v40  ;;  %v1112_v57 = vunpack.c.h.b16 %v1062_v40  ;;  %v3480_v23 = vrot.slane %v495_v31, 7  ;;  %v498_v5 = vshll.u32 %v2847_v0, 16  ;;  %vm955_vm1 = vmpackc.low %vm3494_vm15, %vm3494_vm15 }
  0x5f   : > { %2134 = vrot.lane.b32.xlu2 %v2104_v22, %s2930_s21  ;;  %v985_v49 = vsel %vm953_vm0, 65537, %v2928_v2  ;;  %v1271_v0 = vsel %vm4694_vm4, %v1266_v45, %v1270_v30  ;;  %v1314_v22 = vor.u32 %v1312_v4, %v3485_v37  ;;  %v987_v9 = vsel %vm955_vm1, 65537, %v2928_v2 }
  0x60   : > { %vm1115_vm6 = vcmp.ne.s32.totalorder %v1111_v46, %v2987_v8  ;;  %vm1116_vm5 = vcmp.ne.s32.totalorder %v1112_v57, %v3002_v18  ;;  %v1017_v39 = vunpack.c.l.b16 %v985_v49  ;;  %v500_v47 = vor.u32 %v498_v5, %v3480_v23  ;;  %v2848_v49 = vld [vmem:[%s2984_s19 + $0x40] sm:$0xff] }
  0x61   : > { %vm3490_vm8 = vmpackc.low %vm1116_vm5, %vm1115_vm6  ;;  %v1319_v40 = vsel %vm4694_vm4, %v1314_v22, %v3095_v35  ;;  %v1019_v5 = vunpack.c.l.b16 %v987_v9  ;;  %v1419_v58 = vrot.slane %v1207_v50, 1  ;;  %v503_v22 = vshrl.u32 %v2848_v49, 16 }
  0x62   : > { %v3500_v63 = vpack.c.b16 %v1017_v39, %v3008_v21  ;;  %v2063_v27 = vsel %vm3490_vm8, %v3442_v13, 0  ;;  %v3521_v45 = vsel %vm438_vm2, %v3384_v33, %v500_v47  ;;  %v1206_v33 = vsel %vm3130_vm7, %v3458_v34, 0 }
  0x63   : > { %v3516_v31 = vrot.slane %v2063_v27, 1  ;;  %v1276_v4 = vshll.u32 %v3521_v45, 16  ;;  %v3547_v39 = vrot.slane %v1206_v33, 1  ;;  %v1043_v27 = vpack.c.b16 %v1019_v5, %v3008_v21 }
  0x64   : > { %v1063_v19 = vrot.slane %v3500_v63, 7  ;;  %v1208_v47 = vsel %vm3284_vm9, %v3072_v12, 0  ;;  %v3576_v33 = vrot.slane %v503_v22, 7 }
  0x65   : > { %v2106_v35 = vsel %vm4695_vm12, %v3437_v38, %v3516_v31  ;;  %4736 = vst [vmem:[#allocation5_spill] sm:$0xff] %v3547_v39  ;;  %v3552_v63 = vrot.slane %v1276_v4, 1  ;;  %v1421_v50 = vrot.slane %v1208_v47, 1 }
  0x66   : > { %1690 = vrot.lane.b32.xlu1 %v1659_v53, %s2930_s21  ;;  %1433 = vrot.lane.b32.xlu0 %v1402_v10, %s2930_s21  ;;  %v1064_v25 = vsel %vm4685_vm3, %v1061_v26, %v1063_v19  ;;  %v1635_v53 = vsel %vm4695_vm12, %v3423_v44, %v3508_v17  ;;  %v215_v26 = vadd.s32 136, %v2971_v1  ;;  %v1199_v10 = vsel %vm3490_vm8, %v3259_v54, 0 }
  0x67   : > { %1356 = vrot.lane.b32.xlu2 %v1271_v0, %s2929_s20  ;;  %v1118_v46 = vunpack.c.l.b16 %v1064_v25  ;;  %v1119_v57 = vunpack.c.h.b16 %v1064_v25  ;;  %v1272_v44 = vshrl.u32 %v3442_v13, 16  ;;  %v1403_v14 = vrot.slane %v1199_v10, 1 }
  0x68   : > { %v247_v0 = vand.u32 15, %v215_v26  ;;  %v1420_v25 = vsel %vm4695_vm12, %v3547_v39, %v1419_v58  ;;  %v1065_v26 = vrot.slane %v1043_v27, 7  ;;  %v506_v10 = vshll.u32 %v2848_v49, 16 }
  0x69   : > { %vm1122_vm0 = vcmp.ne.s32.totalorder %v1118_v46, %v2987_v8  ;;  %vm1123_vm6 = vcmp.ne.s32.totalorder %v1119_v57, %v3002_v18  ;;  %v1274_v38 = vor.u32 %v1272_v44, %v1270_v30  ;;  %v1404_v9 = vsel %vm4695_vm12, %v3466_v32, %v1403_v14  ;;  %v2849_v57 = vld [vmem:[%s2984_s19 + $0x48] sm:$0xff]  ;;  %s2839_s19 = sshll.u32 %s4904_s12, 8 }
  0x6a   : > { %vm3562_vm5 = vmpackc.low %vm1123_vm6, %vm1122_vm0  ;;  %vm311_vm15 = vcmp.ne.s32.totalorder %v247_v0, 15  ;;  %v1588_v30 = vsel %vm3490_vm8, %v3325_v20, 0  ;;  %v2861_v44 = vld [vmem:[%s4679_s1 + $0x28] sm:$0xff]  ;;  %v1066_v5 = vsel %vm4685_vm3, %v1063_v19, %v1065_v26  ;;  %v1422_v0 = vsel %vm4695_vm12, %v1419_v58, %v1421_v50 }
  0x6b   : > { %vm957_vm1 = vmpackc.low %vm311_vm15, %vm311_vm15  ;;  %v1200_v32 = vsel %vm3562_vm5, %v3325_v20, 0  ;;  %v1636_v46 = vrot.slane %v1588_v30, 1  ;;  %2865 = vmatpush.bf16.msra.mxu3 %v2861_v44  ;;  %1819 = vmatpush.bf16.msra.mxu0 %v2861_v44  ;;  %v2064_v27 = vsel %vm3562_vm5, %v3521_v45, 0  ;;  %v511_v47 = vshrl.u32 %v2849_v57, 16 }
  0x6c   : > { %v989_v42 = vsel %vm957_vm1, 65537, %v2928_v2  ;;  %v3584_v4 = vrot.slane %v1200_v32, 1  ;;  %v1589_v19 = vsel %vm3562_vm5, %v3442_v13, 0  ;;  %v1125_v58 = vunpack.c.l.b16 %v1066_v5 }
  0x6d   : > { %v1637_v49 = vsel %vm4695_vm12, %v3508_v17, %v1636_v46  ;;  %v3606_v17 = vld [vmem:[%s4679_s1 + $0x40] sm:$0xff]  ;;  %v3618_v32 = vrot.slane %v1589_v19, 1  ;;  %v200_v39 = vadd.s32 16, %v2971_v1 }
  0x6e   : > { %1666 = vrot.lane.b32.xlu1 %v1635_v53, %s2930_s21  ;;  %1368 = vrot.lane.b32.xlu0 %v1319_v40, %s2929_s20  ;;  %v1279_v40 = vsel %vm4694_vm4, %v1274_v38, %v3552_v63  ;;  %v508_v38 = vor.u32 %v506_v10, %v3576_v33  ;;  %v1209_v53 = vsel %vm3361_vm11, %v3209_v60, 0  ;;  %vm1129_vm8 = vcmp.ne.s32.totalorder %v1125_v58, %v2987_v8 }
  0x6f   : > { %2136 = vrot.lane.b32.xlu2 %v2106_v35, %s2930_s21  ;;  %v1021_v35 = vunpack.c.l.b16 %v989_v42  ;;  %v3624_v42 = vrot.slane %v511_v47, 7  ;;  %2286 = vmatpush.bf16.msra.mxu2 %v3606_v17  ;;  %v2721_v47 = vunpack.i.l.s16 %v3008_v21 }
  0x70   : > { %v3622_v10 = vsel %vm438_vm2, %v3480_v23, %v508_v38  ;;  %v3636_v23 = vld [vmem:[%s4679_s1 + $0x38] sm:$0xff]  ;;  %v1280_v38 = vshrl.u32 %v3521_v45, 16 }
  0x71   : > { %v3595_v22 = vpack.c.b16 %v1021_v35, %v3008_v21  ;;  %v514_v35 = vshll.u32 %v2849_v57, 16  ;;  %v2858_v57 = vld [vmem:[%s4679_s1 + $0x10] sm:$0xff] }
  0x72   : > { %1958 = vmatpush.bf16.msra.mxu1 %v2858_v57 }
  0x73   : > { %v4684_v30 = vrot.slane %v3595_v22, 7  ;;  %v516_v19 = vor.u32 %v514_v35, %v3624_v42  ;;  %2287 = vmatpush.bf16.msra.mxu2 %v3636_v23  ;;  %v2857_v35 = vld [vmem:[%s4679_s1 + $0x8] sm:$0xff] }
  0x75   : > { %v1068_v44 = vsel %vm4685_vm3, %v1065_v26, %v4684_v30  ;;  %v3685_v30 = vsel %vm438_vm2, %v3576_v33, %v516_v19  ;;  %v522_v19 = vshll.u32 %v3382_v41, 16 }
  0x76   : > { %1451 = vrot.lane.b32.xlu1 %v1420_v25, %s2930_s21  ;;  %1435 = vrot.lane.b32.xlu0 %v1404_v9, %s2930_s21  ;;  %v1126_v25 = vunpack.c.h.b16 %v1066_v5  ;;  %v1406_v9 = vsel %vm4695_vm12, %v1403_v14, %v3584_v4  ;;  %v2860_v14 = vld [vmem:[%s4679_s1 + $0x20] sm:$0xff]  ;;  %v2859_v5 = vld [vmem:[%s4679_s1 + $0x18] sm:$0xff]  ;;  %v1132_v58 = vunpack.c.l.b16 %v1068_v44  ;;  %v1296_v15 = vshrl.u32 %v3685_v30, 16 }
  0x77   : > { %1358 = vrot.lane.b32.xlu2 %v1279_v40, %s2929_s20  ;;  %v3610_v40 = vrot.slane %v2064_v27, 1  ;;  %2866 = vmatpush.bf16.msra.mxu3 %v2860_v14  ;;  %v1639_v27 = vsel %vm4695_vm12, %v1636_v46, %v3618_v32  ;;  %v230_v46 = vand.u32 15, %v2971_v1 }
  0x78   : > { %vm1130_vm0 = vcmp.ne.s32.totalorder %v1126_v25, %v3002_v18  ;;  %1820 = vmatpush.bf16.msra.mxu0 %v2860_v14  ;;  %v1133_v25 = vunpack.c.h.b16 %v1068_v44  ;;  %v3669_v14 = vld [vmem:[%s4679_s1 + $0x30] sm:$0xff]  ;;  %v222_v44 = vadd.s32 192, %v2971_v1  ;;  %vm1136_vm5 = vcmp.ne.s32.totalorder %v1132_v58, %v2987_v8  ;;  %1959 = vmatpush.bf16.msra.mxu1 %v2857_v35  ;;  %v2856_v58 = vld [vmem:[%s4679_s1] sm:$0xff] }
  0x79   : > { %v2108_v26 = vsel %vm4695_vm12, %v3516_v31, %v3610_v40  ;;  %vm3653_vm6 = vmpackc.low %vm1130_vm0, %vm1129_vm8  ;;  %2288 = vmatpush.bf16.msra.mxu2 %v3669_v14  ;;  %vm3693_vm1 = vcmp.ne.s32.totalorder %v230_v46, 0 }
  0x7a   : > { %v2065_v31 = vsel %vm3653_vm6, %v3622_v10, 0  ;;  %vm1137_vm15 = vcmp.ne.s32.totalorder %v1133_v25, %v3002_v18  ;;  %v1201_v33 = vsel %vm3653_vm6, %v3442_v13, 0 }
  0x7b   : > { %2867 = vmatpush.bf16.msra.mxu3 %v2859_v5  ;;  %v3681_v29 = vrot.slane %v2065_v31, 1  ;;  %vm3706_vm8 = vmpackc.low %vm1137_vm15, %vm1136_vm5  ;;  %v1288_v31 = vshrl.u32 %v3622_v10, 16 }
  0x7c   : > { %1821 = vmatpush.bf16.msra.mxu0 %v2859_v5  ;;  %1960 = vmatpush.bf16.msra.mxu1 %v2856_v58  ;;  %vm1546_vm15 = vmpackc.low %vm3693_vm1, %vm3693_vm1 }
  0x7d   : > { %v2110_v41 = vsel %vm4695_vm12, %v3610_v40, %v3681_v29  ;;  %v2066_v40 = vsel %vm3706_vm8, %v3685_v30, 0  ;;  %vm4747_vm1 = vmpackc.low %vm3392_vm14, %vm3387_vm13 }
  0x7e   : > { %1668 = vrot.lane.b32.xlu1 %v1637_v49, %s2930_s21  ;;  %1453 = vrot.lane.b32.xlu0 %v1422_v0, %s2930_s21  ;;  %v3644_v0 = vrot.slane %v1209_v53, 1  ;;  %v1284_v49 = vshll.u32 %v3622_v10, 16  ;;  %v1282_v53 = vor.u32 %v1280_v38, %v3552_v63  ;;  %v1590_v63 = vsel %vm3653_vm6, %v3521_v45, 0 }
  0x7f   : > { %1437 = vrot.lane.b32.xlu2 %v1406_v9, %s2930_s21  ;;  %2868 = vmatpush.bf16.msrb.mxu3 %v2858_v57  ;;  %v224_v38 = vadd.s32 208, %v2971_v1  ;;  %v254_v57 = vand.u32 15, %v222_v44 }
  0x80   : > { %v1424_v9 = vsel %vm4695_vm12, %v1421_v50, %v3644_v0  ;;  %v1286_v50 = vrot.slane %v1284_v49, 1 }
  0x81   : > { %v256_v5 = vand.u32 15, %v224_v38  ;;  %vm286_vm0 = vcmp.ne.s32.totalorder %v254_v57, 0  ;;  %v524_v38 = vor.u32 %v522_v19, %v3435_v6  ;;  %v219_v6 = vadd.s32 168, %v2971_v1 }
  0x82   : > { %v1287_v46 = vsel %vm4694_vm4, %v1282_v53, %v1286_v50  ;;  %vm673_vm6 = vmpackc.low %vm286_vm0, %vm286_vm0  ;;  %v3748_v19 = vrot.slane %v2066_v40, 1 }
  0x83   : > { %2869 = vmatpush.bf16.msrb.mxu3 %v2857_v35  ;;  %vm288_vm3 = vcmp.ne.s32.totalorder %v256_v5, 0  ;;  %v217_v35 = vadd.s32 152, %v2971_v1  ;;  %v703_v44 = vsel %vm673_vm6, 65537, %v2928_v2  ;;  %v1290_v5 = vor.u32 %v1288_v31, %v1286_v50 }
  0x84   : > { %vm675_vm5 = vmpackc.low %vm288_vm3, %vm288_vm3  ;;  %v733_v13 = vunpack.c.l.b16 %v703_v44  ;;  %vm3736_vm3 = vcmp.ne.s32.totalorder %v2721_v47, %v3002_v18  ;;  %v1548_v50 = vsel %vm1546_vm15, 65537, %v2928_v2  ;;  %v251_v47 = vand.u32 15, %v219_v6 }
  0x85   : > { %v705_v57 = vsel %vm675_vm5, 65537, %v2928_v2  ;;  %v249_v54 = vand.u32 15, %v217_v35  ;;  %v2112_v40 = vsel %vm4695_vm12, %v3681_v29, %v3748_v19 }
  0x86   : > { %2138 = vrot.lane.b32.xlu1 %v2108_v26, %s2930_s21  ;;  %1670 = vrot.lane.b32.xlu0 %v1639_v27, %s2930_s21  ;;  %v3691_v26 = vpop.permute.xlu2 %1344  ;;  %v3697_v27 = vrot.slane %v1590_v63, 1  ;;  %v3718_v63 = vrot.slane %v1201_v33, 1  ;;  %v735_v20 = vunpack.c.l.b16 %v705_v57  ;;  %vm3775_vm15 = vcmp.ne.s32.totalorder %v251_v47, 15 }
  0x87   : > { %1455 = vrot.lane.b32.xlu2 %v1424_v9, %s2930_s21  ;;  %v1292_v9 = vshll.u32 %v3685_v30, 16  ;;  %2870 = vmatpush.bf16.msrb.mxu3 %v2856_v58  ;;  %v2742_v58 = vunpack.i.l.s16 %v733_v13  ;;  %vm313_vm0 = vcmp.ne.s32.totalorder %v249_v54, 15  ;;  %vm961_vm14 = vmpackc.low %vm3775_vm15, %vm3775_vm15  ;;  %vm1507_vm15 = vcmask 261120  }
  0x88   : > { %v1641_v53 = vsel %vm4695_vm12, %v3618_v32, %v3697_v27  ;;  %v2744_v31 = vunpack.i.l.s16 %v735_v20  ;;  %v1408_v49 = vsel %vm4695_vm12, %v3584_v4, %v3718_v63  ;;  %v1210_v20 = vsel %vm4747_vm1, %v3290_v61, 0  ;;  %vm959_vm6 = vmpackc.low %vm313_vm0, %vm313_vm0 }
  0x89   : > { %v1294_v33 = vrot.slane %v1292_v9, 1  ;;  %v3752_v9 = vsel %vm438_vm2, %v3624_v42, %v524_v38  ;;  %vm837_vm2 = vcmp.ne.s32.totalorder %v2742_v58, %v2987_v8  ;;  %v1202_v4 = vsel %vm3706_vm8, %v3521_v45, 0 }
  0x8a   : > { %vm844_vm5 = vcmp.ne.s32.totalorder %v2744_v31, %v2987_v8  ;;  %v991_v42 = vsel %vm959_vm6, 65537, %v2928_v2  ;;  %v1300_v35 = vshll.u32 %v3752_v9, 16  ;;  %vm3783_vm13 = vmpackc.low %vm3736_vm3, %vm837_vm2  ;;  %v1425_v6 = vrot.slane %v1210_v20, 1 }
  0x8b   : > { %v1023_v38 = vunpack.c.l.b16 %v991_v42  ;;  %v3795_v58 = vrot.slane %v1202_v4, 1  ;;  %vm3801_vm0 = vmpackc.low %vm3736_vm3, %vm844_vm5  ;;  %vm4693_vm2 = vcmask 130048   ;;  %v1572_v20 = vsel %vm3783_vm13, %v3069_v7, 0 }
  0x8c   : > { %v3812_v31 = vrot.slane %v1300_v35, 1  ;;  %v2054_v43 = vsel %vm3783_vm13, %v3072_v12, 0 }
  0x8d   : > { %v1045_v47 = vpack.c.b16 %v1023_v38, %v3008_v21 }
  0x8e   : > { %1360 = vrot.lane.b32.xlu1 %v1287_v46, %s2929_s20  ;;  %2140 = vrot.lane.b32.xlu0 %v2110_v41, %s2930_s21  ;;  %v226_v46 = vadd.s32 224, %v2971_v1  ;;  %v1295_v41 = vsel %vm4694_vm4, %v1290_v5, %v1294_v33  ;;  %v3766_v54 = vpop.permute.xlu2 %1346  ;;  %v1550_v5 = vunpack.c.l.b16 %v1548_v50 }
  0x8f   : > { %1672 = vrot.lane.b32.xlu2 %v1641_v53, %s2930_s21  ;;  %v232_v53 = vand.u32 15, %v200_v39  ;;  %v993_v39 = vsel %vm961_vm14, 65537, %v2928_v2  ;;  %v1069_v4 = vrot.slane %v1045_v47, 7  ;;  %vm4759_vm14 = vcmask 1040384  }
  0x90   : > { %v258_v57 = vand.u32 15, %v226_v46  ;;  %v1025_v50 = vunpack.c.l.b16 %v993_v39 }
  0x91   : > { %vm3823_vm6 = vcmp.ne.s32.totalorder %v232_v53, 0  ;;  %v4758_v53 = vrot.slane %v3595_v22, 7 }
  0x92   : > { %vm3807_vm1 = vcmp.ne.s32.totalorder %v258_v57, 0  ;;  %v3821_v42 = vpack.c.b16 %v1025_v50, %v3008_v21  ;;  %v1591_v21 = vsel %vm3706_vm8, %v3622_v10, 0  ;;  %vm4760_vm8 = vmmov %vm4759_vm14 }
  0x93   : > { %vm677_vm5 = vmpackc.low %vm3807_vm1, %vm3807_vm1  ;;  %v1070_v38 = vsel %vm4759_vm14, %v4758_v53, %v1069_v4  ;;  %vm1781_vm1 = vcmask 392192  }
  0x94   : > { %v3768_v13 = vpop.permute.xlu0 %1348  ;;  %v1140_v39 = vunpack.c.h.b16 %v1070_v38  ;;  %v707_v47 = vsel %vm677_vm5, 65537, %v2928_v2 }
  0x96   : > { %1439 = vrot.lane.b32.xlu1 %v1408_v49, %s2930_s21  ;;  %1362 = vrot.lane.b32.xlu0 %v1295_v41, %s2929_s20  ;;  %v1298_v49 = vor.u32 %v1296_v15, %v1294_v33  ;;  %v873_v41 = vsel %vm3801_vm0, %v3069_v7, 0  ;;  %v1426_v33 = vsel %vm4695_vm12, %v3644_v0, %v1425_v6  ;;  %v1410_v15 = vsel %vm4695_vm12, %v3718_v63, %v3795_v58  ;;  %v3850_v6 = vpop.permute.xlu2 %1350 }
  0x97   : > { %2142 = vrot.lane.b32.xlu2 %v2112_v40, %s2930_s21  ;;  %v2750_v40 = vunpack.i.l.s16 %v1550_v5  ;;  %v1071_v0 = vrot.slane %v3821_v42, 7  ;;  %v1139_v5 = vunpack.c.l.b16 %v1070_v38  ;;  %vm1144_vm5 = vcmp.ne.s32.totalorder %v1140_v39, %v3002_v18 }
  0x98   : > { %v1303_v25 = vsel %vm4694_vm4, %v1298_v49, %v3812_v31  ;;  %v2071_v39 = vsel %vm3139_vm10, %v3209_v60, 0 }
  0x99   : > { %v1072_v22 = vsel %vm4760_vm8, %v1069_v4, %v1071_v0  ;;  %vm1143_vm14 = vcmp.ne.s32.totalorder %v1139_v5, %v2987_v8  ;;  %vm651_vm8 = vmpackc.low %vm3823_vm6, %vm3823_vm6  ;;  %v737_v4 = vunpack.c.l.b16 %v707_v47 }
  0x9a   : > { %v1146_v46 = vunpack.c.l.b16 %v1072_v22  ;;  %vm3871_vm11 = vmpackc.low %vm1144_vm5, %vm1143_vm14  ;;  %v681_v53 = vsel %vm651_vm8, 65537, %v2928_v2  ;;  %vm4765_vm14 = vcmask 1046528   ;;  %vm4773_vm8 = vcmask 1040384  }
  0x9c   : > { %v3835_v35 = vpop.permute.xlu0 %1370  ;;  %vm1150_vm4 = vcmp.ne.s32.totalorder %v1146_v46, %v2987_v8 }
  0x9d   : > { %v3846_v63 = vsel %vm4693_vm2, %v873_v41, %v3835_v35  ;;  %v1717_v57 = vsel %vm4693_vm2, %v1572_v20, %v3835_v35  ;;  %v1147_v41 = vunpack.c.h.b16 %v1072_v22  ;;  %vm1557_vm2 = vcmp.ne.s32.totalorder %v2750_v40, %v2987_v8 }
  0x9e   : > { %1457 = vrot.lane.b32.xlu1 %v1426_v33, %s2930_s21  ;;  %1441 = vrot.lane.b32.xlu0 %v1410_v15, %s2930_s21  ;;  %v1642_v20 = vrot.slane %v1591_v21, 1  ;;  %vm3878_vm6 = vmpackc.low %vm3736_vm3, %vm1557_vm2  ;;  %v202_v33 = vadd.s32 32, %v2971_v1  ;;  %v1203_v15 = vsel %vm3871_vm11, %v3622_v10, 0  ;;  %v2067_v21 = vsel %vm3871_vm11, %v3752_v9, 0 }
  0x9f   : > { %v1685_v50 = vpop.permute.xlu1 %1684  ;;  %1364 = vrot.lane.b32.xlu2 %v1303_v25, %s2929_s20  ;;  %vm1151_vm12 = vcmp.ne.s32.totalorder %v1147_v41, %v3002_v18  ;;  %v3892_v38 = vrot.slane %v1203_v15, 1  ;;  %v2070_v25 = vsel %vm3130_vm7, %v3072_v12, 0  ;;  %v1592_v22 = vsel %vm3871_vm11, %v3685_v30, 0 }
  0xa0   : > { %v1750_v49 = vsel %vm1507_vm15, %v1717_v57, %v1685_v50  ;;  %v2113_v57 = vrot.slane %v2067_v21, 1  ;;  %vm3894_vm2 = vmpackc.low %vm1151_vm12, %vm1150_vm4  ;;  %v2042_v47 = vsel %vm3878_vm6, %v3052_v52, 0  ;;  %v234_v55 = vand.u32 15, %v202_v33 }
  0xa1   : > { %2776 = vmatmul.msk.bf16.vlgmr.msra.gmra.mxu3 %vm1781_vm1, %v1750_v49  ;;  %vm4768_vm4 = vmmov %vm4765_vm14  ;;  %v2068_v46 = vsel %vm3894_vm2, %v3458_v34, 0  ;;  %v711_v41 = vunpack.c.l.b16 %v681_v53  ;;  %v3921_v49 = vpop.permute.xlu2 %2130  ;;  %v1644_v40 = vrot.slane %v1592_v22, 1  ;;  %vm4770_vm7 = vcmask 130048  }
  0xa2   : > { %2871 = vmatpush.bf16.msra.mxu3 %v3606_v17  ;;  %v1643_v17 = vsel %vm4765_vm14, %v3697_v27, %v1642_v20  ;;  %v2746_v27 = vunpack.i.l.s16 %v737_v4  ;;  %v1412_v50 = vsel %vm4768_vm4, %v3795_v58, %v3892_v38  ;;  %vm4769_vm12 = vmmov %vm4768_vm4  ;;  %v3923_v4 = vrot.slane %v2070_v25, 1 }
  0xa3   : > { %v2114_v48 = vsel %vm4769_vm12, %v3748_v19, %v2113_v57  ;;  %v2121_v58 = vrot.slane %v2071_v39, 1  ;;  %v1461_v19 = vsel %vm4770_vm7, 0, %v3691_v26  ;;  %vm4771_vm10 = vmmov %vm4770_vm7  ;;  %v4772_v25 = vrot.slane %v3077_v16, 7 }
  0xa4   : > { %vm851_vm11 = vcmp.ne.s32.totalorder %v2746_v27, %v2987_v8  ;;  %vm3941_vm5 = vcmp.ne.s32.totalorder %v234_v55, 0  ;;  %v2720_v22 = vunpack.i.l.s16 %v711_v41  ;;  %vm4776_vm14 = vmmov %vm4768_vm4  ;;  %v1645_v16 = vsel %vm4768_vm4, %v1642_v20, %v1644_v40 }
  0xa5   : > { %v1074_v26 = vsel %vm4773_vm8, %v1071_v0, %v4772_v25  ;;  %v2122_v27 = vsel %vm4776_vm14, %v3923_v4, %v2121_v58  ;;  %vm3952_vm12 = vmpackc.low %vm3736_vm3, %vm851_vm11  ;;  %v2072_v0 = vsel %vm3284_vm9, %v3290_v61, 0  ;;  %v1593_v55 = vsel %vm3894_vm2, %v3752_v9, 0 }
  0xa6   : > { %2872 = vmatpush.bf16.msra.mxu3 %v3636_v23  ;;  %1674 = vrot.lane.b32.xlu1 %v1643_v17, %s2930_s21  ;;  %v2161_v23 = vsel %vm4771_vm10, %v2042_v47, %v3768_v13  ;;  %v3933_v17 = vrot.slane %v2068_v46, 1  ;;  %v1153_v47 = vunpack.c.l.b16 %v1074_v26  ;;  %vm653_vm7 = vmpackc.low %vm3941_vm5, %vm3941_vm5  ;;  %v874_v11 = vsel %vm3952_vm12, %v3072_v12, 0 }
  0xa7   : > { %2144 = vrot.lane.b32.xlu0 %v2114_v48, %s2930_s21  ;;  %1443 = vrot.lane.b32.xlu2 %v1412_v50, %s2930_s21  ;;  %v1154_v50 = vunpack.c.h.b16 %v1074_v26  ;;  %v1560_v48 = vsel %vm3878_vm6, %v3049_v51, 0  ;;  %vm4779_vm10 = vmmov %vm4768_vm4  ;;  %vm760_vm9 = vcmp.ne.s32.totalorder %v2720_v22, %v2987_v8  ;;  %v3981_v46 = vrot.slane %v2072_v0, 1 }
  0xa8   : > { %v2129_v33 = vpop.permute.xlu1 %2128  ;;  %v1428_v15 = vpop.permute.xlu0 %1427  ;;  %v2116_v20 = vsel %vm4779_vm10, %v2113_v57, %v3933_v17  ;;  %vm4780_vm6 = vcmask 130048   ;;  %vm1157_vm11 = vcmp.ne.s32.totalorder %v1153_v47, %v2987_v8  ;;  %v3998_v25 = vrot.slane %v1593_v55, 1  ;;  %vm4004_vm4 = vmpackc.low %vm3736_vm3, %vm760_vm9 }
  0xa9   : > { %v2194_v21 = vsel %vm1507_vm15, %v2161_v23, %v2129_v33  ;;  %v1509_v53 = vsel %vm1507_vm15, %v1461_v19, %v1428_v15  ;;  %v1693_v41 = vsel %vm4780_vm6, %v1560_v48, %v3766_v54  ;;  %v683_v19 = vsel %vm653_vm7, 65537, %v2928_v2  ;;  %v3989_v15 = vpop.permute.xlu2 %1352  ;;  %vm4781_vm5 = vmmov %vm4780_vm6 }
  0xaa   : > { %2873 = vmatpush.bf16.msra.mxu3 %v3669_v14  ;;  %2820 = vmatmul.msk.bf16.vlgmr.msra.gmra.mxu2 %vm1781_vm1, %v2194_v21  ;;  %v1304_v14 = vshrl.u32 %v3752_v9, 16  ;;  %vm1158_vm8 = vcmp.ne.s32.totalorder %v1154_v50, %v3002_v18  ;;  %vm4782_vm14 = vmmov %vm4781_vm5  ;;  %v2043_v18 = vsel %vm4004_vm4, %v3059_v56, 0  ;;  %v1573_v39 = vsel %vm3801_vm0, %v3072_v12, 0 }
  0xab   : > { %2792 = vmatmul.msk.bf16.vlgmr.msra.gmra.mxu1 %vm1781_vm1, %v1509_v53  ;;  %vm4785_vm7 = vsmask.f32 7424  ;;  %v2124_v22 = vsel %vm4779_vm10, %v2121_v58, %v3981_v46  ;;  %vm4019_vm9 = vmpackc.low %vm1158_vm8, %vm1157_vm11  ;;  %v713_v0 = vunpack.c.l.b16 %v683_v19  ;;  %v1204_v47 = vsel %vm3894_vm2, %v3685_v30, 0 }
  0xac   : > { %v1306_v57 = vor.u32 %v1304_v14, %v3812_v31  ;;  %v204_v14 = vadd.s32 48, %v2971_v1  ;;  %v2069_v12 = vsel %vm4019_vm9, %v3069_v7, 0  ;;  %vm4788_vm6 = vmmov %vm4779_vm10  ;;  %v1205_v5 = vsel %vm4019_vm9, %v3752_v9, 0 }
  0xad   : > { %v1647_v58 = vsel %vm4788_vm6, %v1644_v40, %v3998_v25  ;;  %vm4789_vm11 = vmmov %vm4781_vm5  ;;  %v2722_v55 = vunpack.i.l.s16 %v713_v0  ;;  %vm4796_vm10 = vnez %v4724_v59 }
  0xae   : > { %2152 = vrot.lane.b32.xlu1 %v2122_v27, %s2930_s21  ;;  %v1311_v27 = vsel %vm4785_vm7, %v1306_v57, %v3485_v37  ;;  %v861_v37 = vsel %vm4004_vm4, %v3049_v51, 0  ;;  %v2163_v50 = vsel %vm4789_vm11, %v2043_v18, %v3850_v6  ;;  %vm4790_vm8 = vmmov %vm4781_vm5  ;;  %v2117_v51 = vrot.slane %v2069_v12, 1 }
  0xaf   : > { %1676 = vrot.lane.b32.xlu0 %v1645_v16, %s2930_s21  ;;  %2146 = vrot.lane.b32.xlu2 %v2116_v20, %s2930_s21  ;;  %v228_v20 = vadd.s32 240, %v2971_v1  ;;  %vm4791_vm2 = vmmov %vm4781_vm5  ;;  %v2055_v16 = vsel %vm3801_vm0, %v3209_v60, 0 }
  0xb0   : > { %v1661_v23 = vpop.permute.xlu1 %1660  ;;  %v1373_v33 = vpop.permute.xlu0 %1372  ;;  %v1464_v40 = vsel %vm4791_vm2, %v861_v37, %v3766_v54 }
  0xb1   : > { %v1726_v21 = vsel %vm1507_vm15, %v1693_v41, %v1661_v23  ;;  %v3993_v31 = vsel %vm4781_vm5, %v874_v11, %v1373_v33  ;;  %v3996_v53 = vsel %vm4782_vm14, %v2054_v43, %v1373_v33  ;;  %v1719_v48 = vsel %vm4790_vm8, %v1573_v39, %v1373_v33  ;;  %v2133_v18 = vpop.permute.xlu2 %2132  ;;  %vm4792_vm5 = vmmov %vm4788_vm6 }
  0xb2   : > { %2764 = vmatmul.msk.bf16.vlgmr.msra.gmra.mxu0 %vm1781_vm1, %v1726_v21  ;;  %v1413_v11 = vrot.slane %v1204_v47, 1  ;;  %v236_v43 = vand.u32 15, %v204_v14  ;;  %v2196_v23 = vsel %vm1507_vm15, %v2163_v50, %v3921_v49  ;;  %v4051_v21 = vrot.slane %v1205_v5, 1  ;;  %vm4793_vm14 = vmmov %vm4792_vm5 }
  0xb3   : > { %v260_v54 = vand.u32 15, %v228_v20  ;;  %v1594_v14 = vsel %vm4019_vm9, %v3458_v34, 0  ;;  %vm767_vm6 = vcmp.ne.s32.totalorder %v2722_v55, %v2987_v8  ;;  %vm4797_vm11 = vmmov %vm4792_vm5  ;;  %v1574_v20 = vsel %vm3952_vm12, %v3209_v60, 0 }
  0xb4   : > { %v1414_v39 = vsel %vm4792_vm5, %v3892_v38, %v1413_v11  ;;  %vm4060_vm7 = vcmp.ne.s32.totalorder %v236_v43, 0  ;;  %v1561_v38 = vsel %vm4004_vm4, %v3052_v52, 0  ;;  %v1648_v0 = vrot.slane %v1594_v14, 1  ;;  %vm4090_vm4 = vmpackc.low %vm3736_vm3, %vm767_vm6 }
  0xb5   : > { %vm4078_vm8 = vcmp.ne.s32.totalorder %v260_v54, 0  ;;  %vm655_vm9 = vmpackc.low %vm4060_vm7, %vm4060_vm7  ;;  %v1695_v12 = vsel %vm4791_vm2, %v1561_v38, %v3768_v13  ;;  %v2044_v5 = vsel %vm4090_vm4, %v3169_v28, 0  ;;  %v2074_v43 = vshrl.u32 %v3343_v24, 16 }
  0xb6   : > { %1366 = vrot.lane.b32.xlu1 %v1311_v27, %s2929_s20  ;;  %v2118_v27 = vsel %vm4793_vm14, %v3933_v17, %v2117_v51  ;;  %v1416_v17 = vsel %vm4797_vm11, %v1413_v11, %v4051_v21  ;;  %vm679_vm0 = vmpackc.low %vm4078_vm8, %vm4078_vm8 }
  0xb7   : > { %2154 = vrot.lane.b32.xlu0 %v2124_v22, %s2930_s21  ;;  %1678 = vrot.lane.b32.xlu2 %v1647_v58, %s2930_s21  ;;  %v2073_v22 = vsel %vm4796_vm10, %v3343_v24, 0  ;;  %vm4802_vm5 = vmmov %vm4791_vm2  ;;  %v709_v55 = vsel %vm679_vm0, 65537, %v2928_v2 }
  0xb8   : > { %v1687_v57 = vpop.permute.xlu1 %1686  ;;  %v1430_v41 = vpop.permute.xlu0 %1429  ;;  %v2125_v26 = vrot.slane %v2073_v22, 1  ;;  %vm4803_vm14 = vmmov %vm4797_vm11  ;;  %v739_v54 = vunpack.c.l.b16 %v709_v55 }
  0xb9   : > { %v1752_v19 = vsel %vm1507_vm15, %v1719_v48, %v1687_v57  ;;  %v1511_v33 = vsel %vm1507_vm15, %v1464_v40, %v1430_v41  ;;  %v685_v48 = vsel %vm655_vm9, 65537, %v2928_v2  ;;  %vm4804_vm7 = vmmov %vm4797_vm11  ;;  %v862_v41 = vsel %vm4090_vm4, %v3052_v52, 0 }
  0xba   : > { %2777 = vmatmul.msk.bf16.gmra.mxu3 %vm1781_vm1, %v1752_v19  ;;  %2821 = vmatmul.msk.bf16.gmra.mxu2 %vm1781_vm1, %v2196_v23  ;;  %v2126_v11 = vsel %vm4803_vm14, %v3981_v46, %v2125_v26  ;;  %v1649_v40 = vsel %vm4804_vm7, %v3998_v25, %v1648_v0  ;;  %v715_v57 = vunpack.c.l.b16 %v685_v48  ;;  %v4124_v19 = vpop.permute.xlu2 %1354  ;;  %vm4805_vm10 = vmmov %vm4804_vm7  ;;  %v2076_v52 = vor.u32 %v2074_v43, %v3426_v36  ;;  %v4819_v48 = vld [vmem:[#allocation2_spill] sm:$0xff] }
  0xbb   : > { %2793 = vmatmul.msk.bf16.gmra.mxu1 %vm1781_vm1, %v1511_v33  ;;  %v2120_v23 = vsel %vm4805_vm10, %v2117_v51, %v3923_v4  ;;  %v206_v33 = vadd.s32 64, %v2971_v1  ;;  %vm4806_vm6 = vmmov %vm4791_vm2  ;;  %v2748_v36 = vunpack.i.l.s16 %v739_v54  ;;  %vm4809_vm9 = vsmask.f32 7424 }
  0xbc   : > { %v2165_v46 = vsel %vm4806_vm6, %v2044_v5, %v3989_v15  ;;  %vm4807_vm11 = vmmov %vm4791_vm2  ;;  %v2724_v51 = vunpack.i.l.s16 %v715_v57  ;;  %v208_v57 = vadd.s32 80, %v2971_v1 }
  0xbd   : > { %vm4808_vm8 = vmmov %vm4791_vm2  ;;  %v2198_v22 = vsel %vm1507_vm15, %v2165_v46, %v2133_v18  ;;  %v238_v38 = vand.u32 15, %v206_v33  ;;  %v1562_v18 = vsel %vm4090_vm4, %v3059_v56, 0 }
  0xbe   : > { %1445 = vrot.lane.b32.xlu1 %v1414_v39, %s2930_s21  ;;  %v1467_v39 = vsel %vm4808_vm8, %v862_v41, %v3768_v13  ;;  %v2077_v13 = vsel %vm4809_vm9, %v2076_v52, %v2974_v3  ;;  %vm4810_vm2 = vmmov %vm4804_vm7  ;;  %vm774_vm0 = vcmp.ne.s32.totalorder %v2724_v51, %v2987_v8  ;;  %vm858_vm7 = vcmp.ne.s32.totalorder %v2748_v36, %v2987_v8 }
  0xbf   : > { %2148 = vrot.lane.b32.xlu0 %v2118_v27, %s2930_s21  ;;  %1447 = vrot.lane.b32.xlu2 %v1416_v17, %s2930_s21  ;;  %v2127_v17 = vsel %vm4810_vm2, %v2125_v26, %v2974_v3  ;;  %vm4155_vm14 = vcmp.ne.s32.totalorder %v238_v38, 0  ;;  %vm4167_vm4 = vmpackc.low %vm3736_vm3, %vm774_vm0  ;;  %v4828_v38 = vld [vmem:[#allocation3_spill] sm:$0xff] }
  0xc0   : > { %v1663_v37 = vpop.permute.xlu1 %1662  ;;  %v4097_v29 = vpop.permute.xlu0 %1374  ;;  %vm4816_vm10 = vmmov %vm4806_vm6  ;;  %v2045_v5 = vsel %vm4167_vm4, %v4819_v48, 0  ;;  %v863_v55 = vsel %vm4167_vm4, %v3059_v56, 0 }
  0xc1   : > { %v1728_v58 = vsel %vm1507_vm15, %v1695_v12, %v1663_v37  ;;  %v4105_v50 = vsel %vm4802_vm5, %v2055_v16, %v4097_v29  ;;  %v1721_v25 = vsel %vm4807_vm11, %v1574_v20, %v4097_v29  ;;  %vm4811_vm5 = vmmov %vm4810_vm2  ;;  %v2056_v12 = vsel %vm3952_vm12, %v3290_v61, 0 }
  0xc2   : > { %2765 = vmatmul.msk.bf16.gmra.mxu0 %vm1781_vm1, %v1728_v58  ;;  %v1651_v59 = vsel %vm4811_vm5, %v1648_v0, %v3152_v62  ;;  %v2135_v3 = vpop.permute.xlu2 %2134  ;;  %v1697_v62 = vsel %vm4816_vm10, %v1562_v18, %v3850_v6  ;;  %vm657_vm12 = vmpackc.low %vm4155_vm14, %vm4155_vm14 }
  0xc3   : > { %vm4183_vm11 = vmpackc.low %vm3736_vm3, %vm858_vm7  ;;  %v687_v43 = vsel %vm657_vm12, 65537, %v2928_v2 }
  0xc4   : > { %v1575_v20 = vsel %vm4183_vm11, %v3290_v61, 0  ;;  %vm4821_vm8 = vmmov %vm4810_vm2  ;;  %v717_v61 = vunpack.c.l.b16 %v687_v43 }
  0xc5   : > { %vm4822_vm9 = vmmov %vm4806_vm6 }
  0xc6   : > { %2156 = vrot.lane.b32.xlu1 %v2126_v11, %s2930_s21  ;;  %v4820_v11 = vld [vmem:[#allocation5_spill] sm:$0xff]  ;;  %v2167_v41 = vsel %vm4822_vm9, %v2045_v5, %v4124_v19  ;;  %vm4823_vm2 = vmmov %vm4806_vm6 }
  0xc7   : > { %1680 = vrot.lane.b32.xlu0 %v1649_v40, %s2930_s21  ;;  %2150 = vrot.lane.b32.xlu2 %v2120_v23, %s2930_s21  ;;  %v1418_v40 = vsel %vm4821_vm8, %v4051_v21, %v4820_v11  ;;  %vm4824_vm0 = vmmov %vm4823_vm2  ;;  %v2200_v56 = vsel %vm1507_vm15, %v2167_v41, %v2135_v3 }
  0xc8   : > { %v1689_v27 = vpop.permute.xlu1 %1688  ;;  %v1432_v4 = vpop.permute.xlu0 %1431  ;;  %v1470_v33 = vsel %vm4824_vm0, %v863_v55, %v3850_v6  ;;  %v1563_v6 = vsel %vm4167_vm4, %v3169_v28, 0  ;;  %vm4825_vm7 = vmmov %vm4824_vm0 }
  0xc9   : > { %v1754_v49 = vsel %vm1507_vm15, %v1721_v25, %v1689_v27  ;;  %v1513_v14 = vsel %vm1507_vm15, %v1467_v39, %v1432_v4  ;;  %v240_v39 = vand.u32 15, %v208_v57  ;;  %v2726_v27 = vunpack.i.l.s16 %v717_v61  ;;  %vm4829_vm4 = vmmov %vm4824_vm0  ;;  %v4834_v61 = vld [vmem:[#allocation4_spill] sm:$0xff] }
  0xca   : > { %2778 = vmatmul.msk.bf16.gmra.mxu3 %vm1781_vm1, %v1754_v49  ;;  %2822 = vmatmul.msk.bf16.gmra.mxu2 %vm1781_vm1, %v2198_v22  ;;  %v4208_v25 = vpop.permute.xlu2 %1356  ;;  %v1699_v4 = vsel %vm4825_vm7, %v1563_v6, %v3989_v15  ;;  %vm4831_vm8 = vmmov %vm4824_vm0 }
  0xcb   : > { %2794 = vmatmul.msk.bf16.gmra.mxu1 %vm1781_vm1, %v1513_v14  ;;  %vm272_vm5 = vcmp.ne.s32.totalorder %v240_v39, 0  ;;  %vm781_vm14 = vcmp.ne.s32.totalorder %v2726_v27, %v2987_v8  ;;  %vm4836_vm7 = vmmov %vm4824_vm0 }
  0xcc   : > { %vm659_vm10 = vmpackc.low %vm272_vm5, %vm272_vm5 }
  0xcd   : > { %vm4227_vm12 = vmpackc.low %vm3736_vm3, %vm781_vm14  ;;  %v689_v18 = vsel %vm659_vm10, 65537, %v2928_v2 }
  0xce   : > { %2078 = vrot.lane.b32.xlu1 %v2077_v13, %s2929_s20  ;;  %v2046_v36 = vsel %vm4227_vm12, %v4828_v38, 0  ;;  %v864_v16 = vsel %vm4227_vm12, %v3169_v28, 0  ;;  %v719_v26 = vunpack.c.l.b16 %v689_v18  ;;  %vm4835_vm14 = vmmov %vm4824_vm0 }
  0xcf   : > { %2158 = vrot.lane.b32.xlu0 %v2127_v17, %s2930_s21  ;;  %1682 = vrot.lane.b32.xlu2 %v1651_v59, %s2930_s21  ;;  %v872_v17 = vsel %vm3783_vm13, %v3458_v34, 0  ;;  %v210_v59 = vadd.s32 96, %v2971_v1 }
  0xd0   : > { %v1665_v0 = vpop.permute.xlu1 %1664  ;;  %v1609_v47 = vpop.permute.xlu0 %1608  ;;  %v2728_v28 = vunpack.i.l.s16 %v719_v26 }
  0xd1   : > { %v1730_v42 = vsel %vm1507_vm15, %v1697_v62, %v1665_v0  ;;  %v4179_v37 = vsel %vm4806_vm6, %v2056_v12, %v1609_v47  ;;  %v1724_v23 = vsel %vm4823_vm2, %v1575_v20, %v1609_v47  ;;  %v2169_v12 = vsel %vm4829_vm4, %v2046_v36, %v4208_v25  ;;  %vm4830_vm6 = vmmov %vm4824_vm0 }
  0xd2   : > { %2766 = vmatmul.msk.bf16.gmra.mxu0 %vm1781_vm1, %v1730_v42  ;;  %v2137_v13 = vpop.permute.xlu2 %2136  ;;  %v1473_v62 = vsel %vm4831_vm8, %v864_v16, %v3989_v15  ;;  %v242_v44 = vand.u32 15, %v210_v59  ;;  %v1564_v15 = vsel %vm4227_vm12, %v4819_v48, 0  ;;  %vm788_vm9 = vcmp.ne.s32.totalorder %v2728_v28, %v2987_v8  ;;  %vm4839_vm8 = vmmov %vm4824_vm0 }
  0xd3   : > { %v2202_v5 = vsel %vm1507_vm15, %v2169_v12, %v2137_v13  ;;  %vm4266_vm5 = vmpackc.low %vm3736_vm3, %vm788_vm9 }
  0xd4   : > { %vm274_vm13 = vcmp.ne.s32.totalorder %v242_v44, 0  ;;  %vm4841_vm9 = vmmov %vm4824_vm0 }
  0xd5   : > { %vm661_vm2 = vmpackc.low %vm274_vm13, %vm274_vm13 }
  0xd6   : > { %1449 = vrot.lane.b32.xlu1 %v1418_v40, %s2930_s21  ;;  %v1701_v40 = vsel %vm4824_vm0, %v1564_v15, %v4124_v19  ;;  %vm4840_vm13 = vmmov %vm4824_vm0  ;;  %s4439_s21 = scalar_lea.vmem %s4681_s3, %s2839_s19 }
  0xd8   : > { %v1691_v21 = vpop.permute.xlu1 %1690  ;;  %v1434_v46 = vpop.permute.xlu0 %1433 }
  0xd9   : > { %v1756_v54 = vsel %vm1507_vm15, %v1724_v23, %v1691_v21  ;;  %v1515_v52 = vsel %vm1507_vm15, %v1470_v33, %v1434_v46  ;;  %v691_v23 = vsel %vm661_vm2, 65537, %v2928_v2  ;;  %v2047_v33 = vsel %vm4266_vm5, %v4834_v61, 0 }
  0xda   : > { %2779 = vmatmul.msk.bf16.gmra.mxu3 %vm1781_vm1, %v1756_v54  ;;  %2823 = vmatmul.msk.bf16.gmra.mxu2 %vm1781_vm1, %v2200_v56  ;;  %v4258_v11 = vpop.permute.xlu2 %1358  ;;  %v212_v21 = vadd.s32 112, %v2971_v1  ;;  %v721_v46 = vunpack.c.l.b16 %v691_v23  ;;  %v865_v54 = vsel %vm4266_vm5, %v4819_v48, 0 }
  0xdb   : > { %2795 = vmatmul.msk.bf16.gmra.mxu1 %vm1781_vm1, %v1515_v52  ;;  %v2171_v56 = vsel %vm4835_vm14, %v2047_v33, %v4258_v11  ;;  %v1476_v6 = vsel %vm4836_vm7, %v865_v54, %v4124_v19  ;;  %v1565_v19 = vsel %vm4266_vm5, %v4828_v38, 0  ;;  %vm4842_vm5 = vmmov %vm4836_vm7  ;;  %v216_v33 = vadd.s32 144, %v2971_v1 }
  0xdc   : > { %v244_v39 = vand.u32 15, %v212_v21  ;;  %v1703_v36 = vsel %vm4839_vm8, %v1565_v19, %v4208_v25 }
  0xde   : > { %vm276_vm10 = vcmp.ne.s32.totalorder %v244_v39, 0 }
  0xdf   : > { %vm663_vm4 = vmpackc.low %vm276_vm10, %vm276_vm10 }
  0xe0   : > { %v1667_v51 = vpop.permute.xlu1 %1666  ;;  %v4222_v49 = vpop.permute.xlu0 %1368  ;;  %v693_v16 = vsel %vm663_vm4, 65537, %v2928_v2  ;;  %vm4845_vm10 = vmmov %vm4842_vm5 }
  0xe1   : > { %v1732_v22 = vsel %vm1507_vm15, %v1699_v4, %v1667_v51  ;;  %v1497_v3 = vsel %vm4830_vm6, %v872_v17, %v4222_v49  ;;  %v2730_v4 = vunpack.i.l.s16 %v721_v46  ;;  %v875_v46 = vsel %vm4183_vm11, %v3209_v60, 0  ;;  %vm4847_vm4 = vmmov %vm4842_vm5 }
  0xe2   : > { %2767 = vmatmul.msk.bf16.gmra.mxu0 %vm1781_vm1, %v1732_v22  ;;  %v1438_v52 = vpop.permute.xlu2 %1437 }
  0xe3   : > { %v1519_v48 = vsel %vm1507_vm15, %v1476_v6, %v1438_v52  ;;  %vm795_vm12 = vcmp.ne.s32.totalorder %v2730_v4, %v2987_v8  ;;  %v248_v4 = vand.u32 15, %v216_v33 }
  0xe4   : > { %vm4296_vm6 = vmpackc.low %vm3736_vm3, %vm795_vm12 }
  0xe5   : > { %v2048_v18 = vsel %vm4296_vm6, %v3521_v45, 0  ;;  %v866_v44 = vsel %vm4296_vm6, %v4828_v38, 0  ;;  %v1566_v38 = vsel %vm4296_vm6, %v4834_v61, 0  ;;  %vm4846_vm12 = vmmov %vm4842_vm5  ;;  %vm280_vm6 = vcmp.ne.s32.totalorder %v248_v4, 0 }
  0xe6   : > { %v1506_v6 = vsel %vm4846_vm12, %v875_v46, %v4097_v29 }
  0xe8   : > { %v1452_v0 = vpop.permute.xlu1 %1451  ;;  %v1436_v47 = vpop.permute.xlu0 %1435 }
  0xe9   : > { %v1533_v42 = vsel %vm1507_vm15, %v1497_v3, %v1452_v0  ;;  %v1517_v20 = vsel %vm1507_vm15, %v1473_v62, %v1436_v47  ;;  %v214_v3 = vadd.s32 128, %v2971_v1  ;;  %v723_v62 = vunpack.c.l.b16 %v693_v16 }
  0xea   : > { %2804 = vmatmul.msk.bf16.vlgmr.msrb.gmra.mxu3 %vm1781_vm1, %v1533_v42  ;;  %2824 = vmatmul.msk.bf16.gmra.mxu2 %vm1781_vm1, %v2202_v5  ;;  %v1456_v17 = vpop.permute.xlu2 %1455  ;;  %v1479_v5 = vsel %vm4841_vm9, %v866_v44, %v4208_v25 }
  0xeb   : > { %2796 = vmatmul.msk.bf16.gmra.mxu1 %vm1781_vm1, %v1517_v20  ;;  %v246_v47 = vand.u32 15, %v214_v3  ;;  %v2732_v20 = vunpack.i.l.s16 %v723_v62  ;;  %v1537_v28 = vsel %vm1507_vm15, %v3993_v31, %v1456_v17  ;;  %v1705_v31 = vsel %vm4842_vm5, %v1566_v38, %v4258_v11 }
  0xed   : > { %vm278_vm2 = vcmp.ne.s32.totalorder %v246_v47, 0  ;;  %vm802_vm0 = vcmp.ne.s32.totalorder %v2732_v20, %v2987_v8 }
  0xee   : > { %vm665_vm14 = vmpackc.low %vm278_vm2, %vm278_vm2 }
  0xef   : > { %vm4335_vm7 = vmpackc.low %vm3736_vm3, %vm802_vm0  ;;  %v695_v23 = vsel %vm665_vm14, 65537, %v2928_v2 }
  0xf0   : > { %v1669_v43 = vpop.permute.xlu1 %1668  ;;  %v1454_v55 = vpop.permute.xlu0 %1453  ;;  %v867_v52 = vsel %vm4335_vm7, %v4834_v61, 0  ;;  %v1567_v29 = vsel %vm4335_vm7, %v3521_v45, 0  ;;  %vm4850_vm2 = vmmov %vm4847_vm4 }
  0xf1   : > { %v1734_v57 = vsel %vm1507_vm15, %v1701_v40, %v1669_v43  ;;  %v1535_v51 = vsel %vm1507_vm15, %v3846_v63, %v1454_v55  ;;  %vm4851_vm0 = vmmov %vm4850_vm2 }
  0xf2   : > { %2768 = vmatmul.msk.bf16.gmra.mxu0 %vm1781_vm1, %v1734_v57  ;;  %v1673_v40 = vpop.permute.xlu2 %1672  ;;  %v2049_v57 = vsel %vm4335_vm7, %v3622_v10, 0  ;;  %vm4852_vm5 = vmmov %vm4851_vm0 }
  0xf3   : > { %v1738_v41 = vsel %vm1507_vm15, %v1705_v31, %v1673_v40  ;;  %vm4855_vm12 = vmmov %vm4851_vm0 }
  0xf8   : > { %v2139_v27 = vpop.permute.xlu1 %2138  ;;  %v1671_v14 = vpop.permute.xlu0 %1670 }
  0xf9   : > { %v2204_v22 = vsel %vm1507_vm15, %v2171_v56, %v2139_v27  ;;  %v1736_v59 = vsel %vm1507_vm15, %v1703_v36, %v1671_v14  ;;  %v725_v56 = vunpack.c.l.b16 %v695_v23 }
  0xfa   : > { %2805 = vmatmul.msk.bf16.gmra.mxu3 %vm1781_vm1, %v1535_v51  ;;  %2825 = vmatmul.msk.bf16.gmra.mxu2 %vm1781_vm1, %v2204_v22  ;;  %v2143_v54 = vpop.permute.xlu2 %2142  ;;  %v1482_v51 = vsel %vm4847_vm4, %v867_v52, %v4258_v11 }
  0xfb   : > { %2797 = vmatmul.msk.bf16.gmra.mxu1 %vm1781_vm1, %v1519_v48  ;;  %v2734_v22 = vunpack.i.l.s16 %v725_v56 }
  0xfd   : > { %vm809_vm8 = vcmp.ne.s32.totalorder %v2734_v22, %v2987_v8 }
  0xfe   : > { %vm4372_vm9 = vmpackc.low %vm3736_vm3, %vm809_vm8 }
  0xff   : > { %v2050_v63 = vsel %vm4372_vm9, %v3685_v30, 0 }
 0x100   : > { %v4302_v13 = vpop.permute.xlu1 %1360  ;;  %v2141_v12 = vpop.permute.xlu0 %2140 }
 0x101   : > { %v2173_v26 = vsel %vm4840_vm13, %v2048_v18, %v4302_v13  ;;  %vm667_vm13 = vmpackc.low %vm280_vm6, %vm280_vm6  ;;  %v1707_v19 = vsel %vm4850_vm2, %v1567_v29, %v4302_v13 }
 0x102   : > { %2769 = vmatmul.msk.bf16.gmra.mxu0 %vm1781_vm1, %v1736_v59  ;;  %v2206_v0 = vsel %vm1507_vm15, %v2173_v26, %v2141_v12  ;;  %v4368_v11 = vpop.permute.xlu2 %1364  ;;  %v697_v17 = vsel %vm667_vm13, 65537, %v2928_v2  ;;  %v868_v12 = vsel %vm4372_vm9, %v3521_v45, 0  ;;  %v218_v26 = vadd.s32 160, %v2971_v1  ;;  %vm4856_vm6 = vmmov %vm4851_vm0 }
 0x103   : > { %v2177_v16 = vsel %vm4851_vm0, %v2050_v63, %v4368_v11  ;;  %v727_v3 = vunpack.c.l.b16 %v697_v17  ;;  %v1485_v62 = vsel %vm4852_vm5, %v868_v12, %v4302_v13  ;;  %vm4857_vm13 = vmmov %vm4851_vm0 }
 0x104   : > { %v250_v20 = vand.u32 15, %v218_v26 }
 0x105   : > { %v2736_v47 = vunpack.i.l.s16 %v727_v3 }
 0x106   : > { %vm282_vm7 = vcmp.ne.s32.totalorder %v250_v20, 0 }
 0x107   : > { %vm816_vm14 = vcmp.ne.s32.totalorder %v2736_v47, %v2987_v8  ;;  %vm669_vm4 = vmpackc.low %vm282_vm7, %vm282_vm7 }
 0x108   : > { %v1440_v42 = vpop.permute.xlu1 %1439  ;;  %v4329_v25 = vpop.permute.xlu0 %1362  ;;  %v699_v46 = vsel %vm669_vm4, 65537, %v2928_v2 }
 0x109   : > { %v1521_v15 = vsel %vm1507_vm15, %v1479_v5, %v1440_v42  ;;  %v2175_v21 = vsel %vm4845_vm10, %v2049_v57, %v4329_v25  ;;  %vm4409_vm10 = vmpackc.low %vm3736_vm3, %vm816_vm14 }
 0x10a   : > { %2806 = vmatmul.msk.bf16.gmra.mxu3 %vm1781_vm1, %v1537_v28  ;;  %2826 = vmatmul.msk.bf16.gmra.mxu2 %vm1781_vm1, %v2206_v0  ;;  %v2208_v27 = vsel %vm1507_vm15, %v2175_v21, %v2143_v54  ;;  %v1444_v42 = vpop.permute.xlu2 %1443  ;;  %v2051_v23 = vsel %vm4409_vm10, %v3752_v9, 0  ;;  %v869_v4 = vsel %vm4409_vm10, %v3622_v10, 0 }
 0x10b   : > { %2798 = vmatmul.msk.bf16.gmra.mxu1 %vm1781_vm1, %v1521_v15  ;;  %v1525_v45 = vsel %vm1507_vm15, %v1485_v62, %v1444_v42  ;;  %v1568_v15 = vsel %vm4372_vm9, %v3622_v10, 0  ;;  %v1488_v10 = vsel %vm4857_vm13, %v869_v4, %v4329_v25  ;;  %vm4858_vm9 = vmmov %vm4851_vm0 }
 0x10c   : > { %vm4866_vm13 = vmmov %vm4851_vm0 }
 0x110   : > { %v1458_v55 = vpop.permute.xlu1 %1457  ;;  %v1442_v39 = vpop.permute.xlu0 %1441 }
 0x111   : > { %v1539_v60 = vsel %vm1507_vm15, %v1506_v6, %v1458_v55  ;;  %v1523_v61 = vsel %vm1507_vm15, %v1482_v51, %v1442_v39  ;;  %v1709_v55 = vsel %vm4855_vm12, %v1568_v15, %v4329_v25  ;;  %v220_v6 = vadd.s32 176, %v2971_v1 }
 0x112   : > { %2770 = vmatmul.msk.bf16.gmra.mxu0 %vm1781_vm1, %v1738_v41  ;;  %v4418_v41 = vld [vmem:[%s4680_s2] ss:$0 sm:$0xff]  ;;  %v2147_v54 = vpop.permute.xlu2 %2146 }
 0x118   : > { %v1675_v14 = vpop.permute.xlu1 %1674 }
 0x119   : > { %v1740_v36 = vsel %vm1507_vm15, %v1707_v19, %v1675_v14  ;;  %v2145_v18 = vpop.permute.xlu0 %2144  ;;  %v729_v14 = vunpack.c.l.b16 %v699_v46 }
 0x11a   : > { %2807 = vmatmul.msk.bf16.gmra.mxu3 %vm1781_vm1, %v1539_v60  ;;  %2827 = vmatmul.msk.bf16.gmra.mxu2 %vm1781_vm1, %v2208_v27  ;;  %v2210_v44 = vsel %vm1507_vm15, %v2177_v16, %v2145_v18  ;;  %v1569_v16 = vsel %vm4409_vm10, %v3685_v30, 0  ;;  %vm4861_vm10 = vmmov %vm4851_vm0 }
 0x11b   : > { %2799 = vmatmul.msk.bf16.gmra.mxu1 %vm1781_vm1, %v1523_v61  ;;  %v1711_v26 = vsel %vm4851_vm0, %v1569_v16, %v4368_v11 }
 0x120   : > { %v2153_v59 = vpop.permute.xlu1 %2152 }
 0x121   : > { %v2218_v5 = vsel %vm1507_vm15, %v3996_v53, %v2153_v59  ;;  %v1677_v13 = vpop.permute.xlu0 %1676  ;;  %v2738_v59 = vunpack.i.l.s16 %v729_v14 }
 0x122   : > { %2771 = vmatmul.msk.bf16.gmra.mxu0 %vm1781_vm1, %v1740_v36  ;;  %v1742_v33 = vsel %vm1507_vm15, %v1709_v55, %v1677_v13  ;;  %v252_v36 = vand.u32 15, %v220_v6 }
 0x123   : > { %vm823_vm14 = vcmp.ne.s32.totalorder %v2738_v59, %v2987_v8 }
 0x124   : > { %v4398_v28 = vpop.f32.mrf.mxu3  ;;  %vm4458_vm2 = vcmp.ne.s32.totalorder %v252_v36, 0  ;;  %vm4473_vm12 = vmpackc.low %vm3736_vm3, %vm823_vm14 }
 0x125   : > { %vm671_vm7 = vmpackc.low %vm4458_vm2, %vm4458_vm2  ;;  %v2052_v55 = vsel %vm4473_vm12, %v3458_v34, 0 }
 0x128   : > { %v1962_v0 = vpop.f32.mrf.mxu1  ;;  %v4405_v53 = vpop.permute.xlu1 %1366 }
 0x129   : > { %v2179_v56 = vsel %vm4856_vm6, %v2051_v23, %v4405_v53  ;;  %v2155_v51 = vpop.permute.xlu0 %2154  ;;  %vm4864_vm6 = vmmov %vm4851_vm0 }
 0x12a   : > { %2828 = vmatmul.msk.bf16.gmra.mxu2 %vm1781_vm1, %v2210_v44  ;;  %2832 = vmatmul.msk.bf16.vlgmr.msra.gmra.mxu3 %vm1781_vm1, %v2218_v5  ;;  %v2212_v29 = vsel %vm1507_vm15, %v2179_v56, %v2147_v54  ;;  %v2220_v63 = vsel %vm1507_vm15, %v4105_v50, %v2155_v51  ;;  %v1679_v44 = vpop.permute.xlu2 %1678 }
 0x12b   : > { %2800 = vmatmul.msk.bf16.gmra.mxu1 %vm1781_vm1, %v1525_v45  ;;  %v1744_v20 = vsel %vm1507_vm15, %v1711_v26, %v1679_v44 }
 0x12c   : > { %v4430_v39 = vpop.f32.mrf.mxu3 }
 0x12d   : > { %v2290_v38 = vpop.f32.mrf.mxu2 }
 0x12f   : > { %v1823_v40 = vpop.f32.mrf.mxu0 }
 0x130   : > { %v1964_v31 = vpop.f32.mrf.mxu1  ;;  %v1963_v57 = vadd.f32 %v1962_v0, %v1823_v40  ;;  %v1446_v60 = vpop.permute.xlu1 %1445  ;;  %v701_v40 = vsel %vm671_vm7, 65537, %v2928_v2  ;;  %vm4870_vm7 = vmmov %vm4851_vm0 }
 0x131   : > { %v1527_v18 = vsel %vm1507_vm15, %v1488_v10, %v1446_v60  ;;  %v2149_v13 = vpop.permute.xlu0 %2148 }
 0x132   : > { %v2370_v21 = vadd.f32 %v2290_v38, %v1963_v57  ;;  %2772 = vmatmul.msk.bf16.gmra.mxu0 %vm1781_vm1, %v1742_v33 }
 0x134   : > { %v2406_v52 = vadd.f32 %v4418_v41, %v2370_v21  ;;  %v731_v21 = vunpack.c.l.b16 %v701_v40 }
 0x135   : > { %v2292_v27 = vpop.f32.mrf.mxu2 }
 0x136   : > { %vm2438_vm8 = vcmp.ge.f32.partialorder %v2406_v52, 0.0  ;;  %v2470_v22 = vmul.f32 0.2, %v2406_v52 }
 0x137   : > { %v1825_v61 = vpop.f32.mrf.mxu0 }
 0x138   : > { %v2502_v48 = vsel %vm2438_vm8, %v2406_v52, %v2470_v22  ;;  %v1965_v1 = vadd.f32 %v1964_v31, %v1825_v61  ;;  %v1967_v19 = vpop.f32.mrf.mxu1  ;;  %v2157_v15 = vpop.permute.xlu1 %2156  ;;  %v870_v31 = vsel %vm4473_vm12, %v3685_v30, 0  ;;  %vm4865_vm8 = vmmov %vm4851_vm0  ;;  %v2740_v22 = vunpack.i.l.s16 %v731_v21 }
 0x139   : > { %2534 = vst.msk [vmem:[%s4439_s21] sm:$0xff] %vm4858_vm9, %v2502_v48  ;;  %v1491_v2 = vsel %vm4864_vm6, %v870_v31, %v4368_v11  ;;  %v2181_v54 = vsel %vm4865_vm8, %v2052_v55, %v4222_v49  ;;  %v2222_v4 = vsel %vm1507_vm15, %v4179_v37, %v2157_v15  ;;  %v1681_v14 = vpop.permute.xlu0 %1680  ;;  %vm4874_vm6 = vmmov %vm4851_vm0 }
 0x13a   : > { %v2371_v17 = vadd.f32 %v2292_v27, %v1965_v1  ;;  %2829 = vmatmul.msk.bf16.gmra.mxu2 %vm1781_vm1, %v2212_v29  ;;  %2833 = vmatmul.msk.bf16.gmra.mxu3 %vm1781_vm1, %v2220_v63  ;;  %v1448_v27 = vpop.permute.xlu2 %1447  ;;  %v2214_v6 = vsel %vm1507_vm15, %v2181_v54, %v2149_v13  ;;  %v1570_v29 = vsel %vm4473_vm12, %v3752_v9, 0  ;;  %vm830_vm2 = vcmp.ne.s32.totalorder %v2740_v22, %v2987_v8  ;;  %vm4873_vm12 = vmmov %vm4851_vm0 }
 0x13b   : > { %2801 = vmatmul.msk.bf16.gmra.mxu1 %vm1781_vm1, %v1527_v18  ;;  %v1529_v11 = vsel %vm1507_vm15, %v1491_v2, %v1448_v27  ;;  %v1713_v10 = vsel %vm4851_vm0, %v1570_v29, %v4405_v53  ;;  %v2057_v18 = vsel %vm4183_vm11, %v3343_v24, 0  ;;  %vm4518_vm14 = vmpackc.low %vm3736_vm3, %vm830_vm2 }
 0x13c   : > { %v2407_v25 = vadd.f32 %v4418_v41, %v2371_v17  ;;  %v1746_v59 = vsel %vm1507_vm15, %v1713_v10, %v1681_v14  ;;  %v2053_v58 = vsel %vm4518_vm14, %v3069_v7, 0  ;;  %vm4871_vm11 = vmmov %vm4851_vm0 }
 0x13d   : > { %v4456_v12 = vpop.f32.mrf.mxu3  ;;  %v2295_v50 = vpop.f32.mrf.mxu2  ;;  %vm4875_vm8 = vmmov %vm4851_vm0 }
 0x13e   : > { %vm2439_vm5 = vcmp.ge.f32.partialorder %v2407_v25, 0.0  ;;  %v2471_v62 = vmul.f32 0.2, %v2407_v25 }
 0x13f   : > { %v1828_v0 = vpop.f32.mrf.mxu0 }
 0x140   : > { %v2503_v47 = vsel %vm2439_vm5, %v2407_v25, %v2471_v62  ;;  %v1968_v42 = vadd.f32 %v1967_v19, %v1828_v0  ;;  %v1969_v5 = vpop.f32.mrf.mxu1  ;;  %v2079_v60 = vpop.permute.xlu1 %2078  ;;  %vm4867_vm5 = vmmov %vm4851_vm0  ;;  %v871_v62 = vsel %vm4518_vm14, %v3752_v9, 0 }
 0x141   : > { %2535 = vst.msk [vmem:[%s4439_s21 + $0x8] sm:$0xff] %vm4861_vm10, %v2503_v47  ;;  %v2159_v24 = vpop.permute.xlu0 %2158  ;;  %vm4872_vm10 = vmmov %vm4851_vm0 }
 0x142   : > { %v2372_v38 = vadd.f32 %v2295_v50, %v1968_v42  ;;  %2773 = vmatmul.msk.bf16.gmra.mxu0 %vm1781_vm1, %v1744_v20  ;;  %v2151_v25 = vpop.permute.xlu2 %2150  ;;  %v2192_v50 = vsel %vm4870_vm7, %v2057_v18, %v2079_v60  ;;  %v1494_v7 = vsel %vm4872_vm10, %v871_v62, %v4405_v53  ;;  %v1571_v53 = vsel %vm4518_vm14, %v3458_v34, 0  ;;  %vm4878_vm14 = vmmov %vm4851_vm0 }
 0x143   : > { %v2224_v42 = vsel %vm1507_vm15, %v2192_v50, %v2159_v24  ;;  %vm4880_vm10 = vmmov %vm4851_vm0 }
 0x144   : > { %v2408_v43 = vadd.f32 %v4418_v41, %v2372_v38 }
 0x145   : > { %v4486_v57 = vpop.f32.mrf.mxu3  ;;  %v2297_v23 = vpop.f32.mrf.mxu2 }
 0x146   : > { %vm2440_vm4 = vcmp.ge.f32.partialorder %v2408_v43, 0.0  ;;  %v2472_v33 = vmul.f32 0.2, %v2408_v43 }
 0x147   : > { %v1830_v46 = vpop.f32.mrf.mxu0 }
 0x148   : > { %v2504_v30 = vsel %vm2440_vm4, %v2408_v43, %v2472_v33  ;;  %v1970_v56 = vadd.f32 %v1969_v5, %v1830_v46  ;;  %v1972_v52 = vpop.f32.mrf.mxu1  ;;  %v1450_v0 = vpop.permute.xlu1 %1449  ;;  %v2183_v5 = vsel %vm4871_vm11, %v2053_v58, %v3835_v35  ;;  %v1715_v33 = vsel %vm4874_vm6, %v1571_v53, %v4222_v49 }
 0x149   : > { %2536 = vst.msk [vmem:[%s4439_s21 + $0x10] sm:$0xff] %vm4866_vm13, %v2504_v30  ;;  %v2216_v15 = vsel %vm1507_vm15, %v2183_v5, %v2151_v25  ;;  %v1531_v38 = vsel %vm1507_vm15, %v1494_v7, %v1450_v0 }
 0x14a   : > { %v2373_v51 = vadd.f32 %v2297_v23, %v1970_v56  ;;  %2830 = vmatmul.msk.bf16.gmra.mxu2 %vm1781_vm1, %v2214_v6  ;;  %2834 = vmatmul.msk.bf16.gmra.mxu3 %vm1781_vm1, %v2222_v4  ;;  %v1683_v43 = vpop.permute.xlu2 %1682 }
 0x14b   : > { %2802 = vmatmul.msk.bf16.gmra.mxu1 %vm1781_vm1, %v1529_v11  ;;  %v1748_v54 = vsel %vm1507_vm15, %v1715_v33, %v1683_v43 }
 0x14c   : > { %v2409_v61 = vadd.f32 %v4418_v41, %v2373_v51 }
 0x14d   : > { %v4505_v37 = vpop.f32.mrf.mxu3  ;;  %v2300_v48 = vpop.f32.mrf.mxu2 }
 0x14e   : > { %vm2441_vm9 = vcmp.ge.f32.partialorder %v2409_v61, 0.0  ;;  %v2473_v1 = vmul.f32 0.2, %v2409_v61 }
 0x14f   : > { %v1833_v19 = vpop.f32.mrf.mxu0 }
 0x150   : > { %v2505_v63 = vsel %vm2441_vm9, %v2409_v61, %v2473_v1  ;;  %v1973_v36 = vadd.f32 %v1972_v52, %v1833_v19  ;;  %v1974_v17 = vpop.f32.mrf.mxu1  ;;  %vm4876_vm9 = vmmov %vm4851_vm0 }
 0x151   : > { %2537 = vst.msk [vmem:[%s4439_s21 + $0x18] sm:$0xff] %vm4867_vm5, %v2505_v63 }
 0x152   : > { %v2374_v8 = vadd.f32 %v2300_v48, %v1973_v36  ;;  %2774 = vmatmul.msk.bf16.gmra.mxu0 %vm1781_vm1, %v1746_v59 }
 0x154   : > { %v2410_v3 = vadd.f32 %v4418_v41, %v2374_v8 }
 0x155   : > { %v4528_v26 = vpop.f32.mrf.mxu3  ;;  %v2302_v32 = vpop.f32.mrf.mxu2 }
 0x156   : > { %vm2442_vm3 = vcmp.ge.f32.partialorder %v2410_v3, 0.0  ;;  %v2474_v44 = vmul.f32 0.2, %v2410_v3 }
 0x157   : > { %v1835_v47 = vpop.f32.mrf.mxu0 }
 0x158   : > { %v2506_v20 = vsel %vm2442_vm3, %v2410_v3, %v2474_v44  ;;  %v1975_v45 = vadd.f32 %v1974_v17, %v1835_v47  ;;  %v1977_v13 = vpop.f32.mrf.mxu1  ;;  %vm4879_vm3 = vmmov %vm4851_vm0 }
 0x159   : > { %2538 = vst.msk [vmem:[%s4439_s21 + $0x20] sm:$0xff] %vm4873_vm12, %v2506_v20 }
 0x15a   : > { %v2375_v9 = vadd.f32 %v2302_v32, %v1975_v45  ;;  %2831 = vmatmul.msk.bf16.gmra.mxu2 %vm1781_vm1, %v2216_v15  ;;  %2835 = vmatmul.msk.bf16.gmra.mxu3 %vm1781_vm1, %v2224_v42 }
 0x15b   : > { %2803 = vmatmul.msk.bf16.gmra.mxu1 %vm1781_vm1, %v1531_v38 }
 0x15c   : > { %v2411_v35 = vadd.f32 %v4418_v41, %v2375_v9 }
 0x15d   : > { %v4549_v40 = vpop.f32.mrf.mxu3  ;;  %v2305_v31 = vpop.f32.mrf.mxu2 }
 0x15e   : > { %vm2443_vm4 = vcmp.ge.f32.partialorder %v2411_v35, 0.0  ;;  %v2475_v55 = vmul.f32 0.2, %v2411_v35 }
 0x15f   : > { %v1838_v23 = vpop.f32.mrf.mxu0 }
 0x160   : > { %v2507_v21 = vsel %vm2443_vm4, %v2411_v35, %v2475_v55  ;;  %v1978_v2 = vadd.f32 %v1977_v13, %v1838_v23  ;;  %v1979_v46 = vpop.f32.mrf.mxu1  ;;  %vm4881_vm4 = vmmov %vm4851_vm0 }
 0x161   : > { %2539 = vst.msk [vmem:[%s4439_s21 + $0x28] sm:$0xff] %vm4875_vm8, %v2507_v21  ;;  %vm4882_vm8 = vmmov %vm4851_vm0 }
 0x162   : > { %v2376_v30 = vadd.f32 %v2305_v31, %v1978_v2  ;;  %2775 = vmatmul.msk.bf16.gmra.mxu0 %vm1781_vm1, %v1748_v54  ;;  %vm4877_vm1 = vmmov %vm4851_vm0 }
 0x164   : > { %v2412_v34 = vadd.f32 %v4418_v41, %v2376_v30 }
 0x165   : > { %v4558_v56 = vpop.f32.mrf.mxu3  ;;  %v2307_v52 = vpop.f32.mrf.mxu2 }
 0x166   : > { %vm2444_vm13 = vcmp.ge.f32.partialorder %v2412_v34, 0.0  ;;  %v2476_v27 = vmul.f32 0.2, %v2412_v34 }
 0x167   : > { %v1840_v49 = vpop.f32.mrf.mxu0 }
 0x168   : > { %v2508_v6 = vsel %vm2444_vm13, %v2412_v34, %v2476_v27  ;;  %v1980_v4 = vadd.f32 %v1979_v46, %v1840_v49  ;;  %v1982_v51 = vpop.f32.mrf.mxu1 }
 0x169   : > { %2540 = vst.msk [vmem:[%s4439_s21 + $0x30] sm:$0xff] %vm4876_vm9, %v2508_v6  ;;  %vm4883_vm9 = vmmov %vm4851_vm0 }
 0x16a   : > { %v2377_v11 = vadd.f32 %v2307_v52, %v1980_v4 }
 0x16c   : > { %v2413_v22 = vadd.f32 %v4418_v41, %v2377_v11 }
 0x16d   : > { %v4563_v14 = vpop.f32.mrf.mxu3  ;;  %v2310_v60 = vpop.f32.mrf.mxu2 }
 0x16e   : > { %vm2445_vm15 = vcmp.ge.f32.partialorder %v2413_v22, 0.0  ;;  %v2477_v61 = vmul.f32 0.2, %v2413_v22 }
 0x16f   : > { %v1843_v29 = vpop.f32.mrf.mxu0 }
 0x170   : > { %v2509_v48 = vsel %vm2445_vm15, %v2413_v22, %v2477_v61  ;;  %v1983_v1 = vadd.f32 %v1982_v51, %v1843_v29  ;;  %v1984_v19 = vpop.f32.mrf.mxu1 }
 0x171   : > { %2541 = vst.msk [vmem:[%s4439_s21 + $0x38] sm:$0xff] %vm4877_vm1, %v2509_v48  ;;  %vm4884_vm1 = vmmov %vm4851_vm0 }
 0x172   : > { %v2378_v10 = vadd.f32 %v2310_v60, %v1983_v1 }
 0x174   : > { %v2414_v63 = vadd.f32 %v4418_v41, %v2378_v10 }
 0x175   : > { %v4568_v36 = vpop.f32.mrf.mxu3  ;;  %v2312_v17 = vpop.f32.mrf.mxu2 }
 0x176   : > { %vm2446_vm2 = vcmp.ge.f32.partialorder %v2414_v63, 0.0  ;;  %v2478_v18 = vmul.f32 0.2, %v2414_v63 }
 0x177   : > { %v1845_v59 = vpop.f32.mrf.mxu0 }
 0x178   : > { %v2510_v16 = vsel %vm2446_vm2, %v2414_v63, %v2478_v18  ;;  %v1985_v8 = vadd.f32 %v1984_v19, %v1845_v59  ;;  %v1987_v25 = vpop.f32.mrf.mxu1 }
 0x179   : > { %2542 = vst.msk [vmem:[%s4439_s21 + $0x40] sm:$0xff] %vm4851_vm0, %v2510_v16 }
 0x17a   : > { %v2379_v50 = vadd.f32 %v2312_v17, %v1985_v8 }
 0x17c   : > { %v2415_v3 = vadd.f32 %v4418_v41, %v2379_v50 }
 0x17d   : > { %v4573_v24 = vpop.f32.mrf.mxu3  ;;  %v2315_v58 = vpop.f32.mrf.mxu2 }
 0x17e   : > { %vm2447_vm5 = vcmp.ge.f32.partialorder %v2415_v3, 0.0  ;;  %v2479_v32 = vmul.f32 0.2, %v2415_v3 }
 0x17f   : > { %v1848_v62 = vpop.f32.mrf.mxu0 }
 0x180   : > { %v2511_v44 = vsel %vm2447_vm5, %v2415_v3, %v2479_v32  ;;  %v1988_v0 = vadd.f32 %v1987_v25, %v1848_v62  ;;  %v1989_v47 = vpop.f32.mrf.mxu1 }
 0x181   : > { %2543 = vst.msk [vmem:[%s4439_s21 + $0x48] sm:$0xff] %vm4878_vm14, %v2511_v44  ;;  %vm4885_vm14 = vmmov %vm4851_vm0 }
 0x182   : > { %v2380_v42 = vadd.f32 %v2315_v58, %v1988_v0  ;;  %v2023_v58 = vadd.f32 %v4563_v14, %v4398_v28  ;;  %v2025_v14 = vadd.f32 %v4568_v36, %v4430_v39 }
 0x184   : > { %v2416_v5 = vadd.f32 %v4418_v41, %v2380_v42 }
 0x185   : > { %v4578_v20 = vpop.f32.mrf.mxu3  ;;  %v2317_v45 = vpop.f32.mrf.mxu2 }
 0x186   : > { %vm2448_vm7 = vcmp.ge.f32.partialorder %v2416_v5, 0.0  ;;  %v2480_v13 = vmul.f32 0.2, %v2416_v5 }
 0x187   : > { %v1850_v7 = vpop.f32.mrf.mxu0 }
 0x188   : > { %v2512_v15 = vsel %vm2448_vm7, %v2416_v5, %v2480_v13  ;;  %v1990_v9 = vadd.f32 %v1989_v47, %v1850_v7  ;;  %v1992_v38 = vpop.f32.mrf.mxu1 }
 0x189   : > { %2544 = vst.msk [vmem:[%s4439_s21 + $0x50] sm:$0xff] %vm4879_vm3, %v2512_v15  ;;  %vm4886_vm3 = vmmov %vm4851_vm0 }
 0x18a   : > { %v2381_v35 = vadd.f32 %v2317_v45, %v1990_v9 }
 0x18c   : > { %v2417_v53 = vadd.f32 %v4418_v41, %v2381_v35 }
 0x18d   : > { %v4583_v31 = vpop.f32.mrf.mxu3  ;;  %v2320_v43 = vpop.f32.mrf.mxu2 }
 0x18e   : > { %vm2449_vm11 = vcmp.ge.f32.partialorder %v2417_v53, 0.0  ;;  %v2481_v55 = vmul.f32 0.2, %v2417_v53 }
 0x18f   : > { %v1853_v23 = vpop.f32.mrf.mxu0 }
 0x190   : > { %v2513_v33 = vsel %vm2449_vm11, %v2417_v53, %v2481_v55  ;;  %v1993_v21 = vadd.f32 %v1992_v38, %v1853_v23  ;;  %v1994_v2 = vpop.f32.mrf.mxu1 }
 0x191   : > { %2545 = vst.msk [vmem:[%s4439_s21 + $0x58] sm:$0xff] %vm4880_vm10, %v2513_v33  ;;  %vm4887_vm10 = vmmov %vm4851_vm0 }
 0x192   : > { %v2382_v46 = vadd.f32 %v2320_v43, %v1993_v21 }
 0x194   : > { %v2418_v54 = vadd.f32 %v4418_v41, %v2382_v46 }
 0x195   : > { %v4588_v30 = vpop.f32.mrf.mxu3  ;;  %v2322_v34 = vpop.f32.mrf.mxu2 }
 0x196   : > { %vm2450_vm12 = vcmp.ge.f32.partialorder %v2418_v54, 0.0  ;;  %v2482_v52 = vmul.f32 0.2, %v2418_v54 }
 0x197   : > { %v1855_v27 = vpop.f32.mrf.mxu0 }
 0x198   : > { %v2514_v49 = vsel %vm2450_vm12, %v2418_v54, %v2482_v52  ;;  %v1995_v6 = vadd.f32 %v1994_v2, %v1855_v27  ;;  %v1997_v4 = vpop.f32.mrf.mxu1  ;;  %v2028_v54 = vadd.f32 %v4573_v24, %v4456_v12 }
 0x199   : > { %2546 = vst.msk [vmem:[%s4439_s21 + $0x60] sm:$0xff] %vm4881_vm4, %v2514_v49  ;;  %vm4888_vm4 = vmmov %vm4851_vm0 }
 0x19a   : > { %v2383_v51 = vadd.f32 %v2322_v34, %v1995_v6 }
 0x19c   : > { %v2419_v11 = vadd.f32 %v4418_v41, %v2383_v51 }
 0x19d   : > { %v4593_v22 = vpop.f32.mrf.mxu3  ;;  %v2325_v60 = vpop.f32.mrf.mxu2 }
 0x19e   : > { %vm2451_vm6 = vcmp.ge.f32.partialorder %v2419_v11, 0.0  ;;  %v2483_v61 = vmul.f32 0.2, %v2419_v11 }
 0x19f   : > { %v1858_v29 = vpop.f32.mrf.mxu0 }
 0x1a0   : > { %v2515_v48 = vsel %vm2451_vm6, %v2419_v11, %v2483_v61  ;;  %v1998_v1 = vadd.f32 %v1997_v4, %v1858_v29  ;;  %v1999_v19 = vpop.f32.mrf.mxu1 }
 0x1a1   : > { %2547 = vst.msk [vmem:[%s4439_s21 + $0x68] sm:$0xff] %vm4882_vm8, %v2515_v48  ;;  %v2030_v48 = vadd.f32 %v4578_v20, %v4486_v57  ;;  %vm4889_vm8 = vmmov %vm4851_vm0 }
 0x1a2   : > { %v2384_v10 = vadd.f32 %v2325_v60, %v1998_v1 }
 0x1a4   : > { %v2420_v63 = vadd.f32 %v4418_v41, %v2384_v10 }
 0x1a5   : > { %v4598_v17 = vpop.f32.mrf.mxu3  ;;  %v2327_v18 = vpop.f32.mrf.mxu2 }
 0x1a6   : > { %vm2452_vm13 = vcmp.ge.f32.partialorder %v2420_v63, 0.0  ;;  %v2484_v59 = vmul.f32 0.2, %v2420_v63 }
 0x1a7   : > { %v1860_v16 = vpop.f32.mrf.mxu0 }
 0x1a8   : > { %v2516_v8 = vsel %vm2452_vm13, %v2420_v63, %v2484_v59  ;;  %v2000_v25 = vadd.f32 %v1999_v19, %v1860_v16  ;;  %v2002_v50 = vpop.f32.mrf.mxu1 }
 0x1a9   : > { %2548 = vst.msk [vmem:[%s4439_s21 + $0x70] sm:$0xff] %vm4883_vm9, %v2516_v8  ;;  %vm4890_vm9 = vmmov %vm4851_vm0 }
 0x1aa   : > { %v2385_v3 = vadd.f32 %v2327_v18, %v2000_v25 }
 0x1ac   : > { %v2421_v32 = vadd.f32 %v4418_v41, %v2385_v3 }
 0x1ad   : > { %v2330_v62 = vpop.f32.mrf.mxu2  ;;  %v2350_v44 = vpop.f32.mrf.mxu3 }
 0x1ae   : > { %vm2453_vm15 = vcmp.ge.f32.partialorder %v2421_v32, 0.0  ;;  %v2485_v0 = vmul.f32 0.2, %v2421_v32  ;;  %v2394_v47 = vadd.f32 %v2350_v44, %v2023_v58  ;;  %v2033_v58 = vadd.f32 %v4583_v31, %v4505_v37 }
 0x1af   : > { %v1863_v42 = vpop.f32.mrf.mxu0 }
 0x1b0   : > { %v2517_v5 = vsel %vm2453_vm15, %v2421_v32, %v2485_v0  ;;  %v2430_v45 = vadd.f32 %v4418_v41, %v2394_v47  ;;  %v2003_v13 = vadd.f32 %v2002_v50, %v1863_v42  ;;  %v2004_v7 = vpop.f32.mrf.mxu1 }
 0x1b1   : > { %2549 = vst.msk [vmem:[%s4439_s21 + $0x78] sm:$0xff] %vm4884_vm1, %v2517_v5  ;;  %vm4891_vm1 = vmmov %vm4851_vm0 }
 0x1b2   : > { %vm2462_vm2 = vcmp.ge.f32.partialorder %v2430_v45, 0.0  ;;  %v2494_v15 = vmul.f32 0.2, %v2430_v45  ;;  %v2386_v28 = vadd.f32 %v2330_v62, %v2003_v13 }
 0x1b4   : > { %v2526_v9 = vsel %vm2462_vm2, %v2430_v45, %v2494_v15  ;;  %v2422_v38 = vadd.f32 %v4418_v41, %v2386_v28  ;;  %v2035_v28 = vadd.f32 %v4588_v30, %v4528_v26 }
 0x1b5   : > { %2558 = vst.msk [vmem:[%s4439_s21 + $0xc0] sm:$0xff] %vm4851_vm0, %v2526_v9  ;;  %v2332_v35 = vpop.f32.mrf.mxu2  ;;  %v2352_v53 = vpop.f32.mrf.mxu3 }
 0x1b6   : > { %vm2454_vm5 = vcmp.ge.f32.partialorder %v2422_v38, 0.0  ;;  %v2486_v43 = vmul.f32 0.2, %v2422_v38  ;;  %v2395_v55 = vadd.f32 %v2352_v53, %v2025_v14 }
 0x1b7   : > { %v1865_v23 = vpop.f32.mrf.mxu0 }
 0x1b8   : > { %v2518_v33 = vsel %vm2454_vm5, %v2422_v38, %v2486_v43  ;;  %v2431_v21 = vadd.f32 %v4418_v41, %v2395_v55  ;;  %v2005_v2 = vadd.f32 %v2004_v7, %v1865_v23  ;;  %v2007_v46 = vpop.f32.mrf.mxu1 }
 0x1b9   : > { %2550 = vst.msk [vmem:[%s4439_s21 + $0x80] sm:$0xff] %vm4885_vm14, %v2518_v33  ;;  %vm4892_vm14 = vmmov %vm4851_vm0 }
 0x1ba   : > { %vm2463_vm7 = vcmp.ge.f32.partialorder %v2431_v21, 0.0  ;;  %v2495_v39 = vmul.f32 0.2, %v2431_v21  ;;  %v2387_v36 = vadd.f32 %v2332_v35, %v2005_v2  ;;  %v2038_v2 = vadd.f32 %v4593_v22, %v4549_v40 }
 0x1bc   : > { %v2527_v34 = vsel %vm2463_vm7, %v2431_v21, %v2495_v39  ;;  %v2423_v52 = vadd.f32 %v4418_v41, %v2387_v36 }
 0x1bd   : > { %2559 = vst.msk [vmem:[%s4439_s21 + $0xc8] sm:$0xff] %vm4886_vm3, %v2527_v34  ;;  %v2335_v27 = vpop.f32.mrf.mxu2  ;;  %v2355_v49 = vpop.f32.mrf.mxu3  ;;  %vm4893_vm3 = vmmov %vm4851_vm0 }
 0x1be   : > { %vm2455_vm11 = vcmp.ge.f32.partialorder %v2423_v52, 0.0  ;;  %v2487_v6 = vmul.f32 0.2, %v2423_v52  ;;  %v2396_v4 = vadd.f32 %v2355_v49, %v2028_v54 }
 0x1bf   : > { %v1868_v51 = vpop.f32.mrf.mxu0 }
 0x1c0   : > { %v2519_v11 = vsel %vm2455_vm11, %v2423_v52, %v2487_v6  ;;  %v2432_v60 = vadd.f32 %v4418_v41, %v2396_v4  ;;  %v2008_v61 = vadd.f32 %v2007_v46, %v1868_v51  ;;  %v2009_v29 = vpop.f32.mrf.mxu1 }
 0x1c1   : > { %2551 = vst.msk [vmem:[%s4439_s21 + $0x88] sm:$0xff] %vm4887_vm10, %v2519_v11  ;;  %vm4894_vm10 = vmmov %vm4851_vm0  ;;  %v2040_v11 = vadd.f32 %v4598_v17, %v4558_v56 }
 0x1c2   : > { %vm2464_vm12 = vcmp.ge.f32.partialorder %v2432_v60, 0.0  ;;  %v2496_v12 = vmul.f32 0.2, %v2432_v60  ;;  %v2388_v24 = vadd.f32 %v2335_v27, %v2008_v61 }
 0x1c4   : > { %v2528_v1 = vsel %vm2464_vm12, %v2432_v60, %v2496_v12  ;;  %v2424_v19 = vadd.f32 %v4418_v41, %v2388_v24 }
 0x1c5   : > { %2560 = vst.msk [vmem:[%s4439_s21 + $0xd0] sm:$0xff] %vm4888_vm4, %v2528_v1  ;;  %v2337_v10 = vpop.f32.mrf.mxu2  ;;  %v2357_v63 = vpop.f32.mrf.mxu3  ;;  %vm4895_vm4 = vmmov %vm4851_vm0 }
 0x1c6   : > { %vm2456_vm6 = vcmp.ge.f32.partialorder %v2424_v19, 0.0  ;;  %v2488_v18 = vmul.f32 0.2, %v2424_v19  ;;  %v2397_v59 = vadd.f32 %v2357_v63, %v2030_v48 }
 0x1c7   : > { %v1870_v16 = vpop.f32.mrf.mxu0 }
 0x1c8   : > { %v2520_v8 = vsel %vm2456_vm6, %v2424_v19, %v2488_v18  ;;  %v2433_v25 = vadd.f32 %v4418_v41, %v2397_v59  ;;  %v2010_v50 = vadd.f32 %v2009_v29, %v1870_v16  ;;  %v2012_v3 = vpop.f32.mrf.mxu1 }
 0x1c9   : > { %2552 = vst.msk [vmem:[%s4439_s21 + $0x90] sm:$0xff] %vm4889_vm8, %v2520_v8  ;;  %vm4896_vm8 = vmmov %vm4851_vm0 }
 0x1ca   : > { %vm2465_vm13 = vcmp.ge.f32.partialorder %v2433_v25, 0.0  ;;  %v2497_v57 = vmul.f32 0.2, %v2433_v25  ;;  %v2389_v20 = vadd.f32 %v2337_v10, %v2010_v50 }
 0x1cc   : > { %v2529_v32 = vsel %vm2465_vm13, %v2433_v25, %v2497_v57  ;;  %v2425_v62 = vadd.f32 %v4418_v41, %v2389_v20 }
 0x1cd   : > { %2561 = vst.msk [vmem:[%s4439_s21 + $0xd8] sm:$0xff] %vm4890_vm9, %v2529_v32  ;;  %v2340_v44 = vpop.f32.mrf.mxu2  ;;  %v2360_v0 = vpop.f32.mrf.mxu3  ;;  %vm4897_vm9 = vmmov %vm4851_vm0 }
 0x1ce   : > { %vm2457_vm15 = vcmp.ge.f32.partialorder %v2425_v62, 0.0  ;;  %v2489_v47 = vmul.f32 0.2, %v2425_v62  ;;  %v2398_v42 = vadd.f32 %v2360_v0, %v2033_v58 }
 0x1cf   : > { %v1873_v5 = vpop.f32.mrf.mxu0 }
 0x1d0   : > { %v2521_v45 = vsel %vm2457_vm15, %v2425_v62, %v2489_v47  ;;  %v2434_v13 = vadd.f32 %v4418_v41, %v2398_v42  ;;  %v2013_v7 = vadd.f32 %v2012_v3, %v1873_v5  ;;  %v2014_v15 = vpop.f32.mrf.mxu1 }
 0x1d1   : > { %2553 = vst.msk [vmem:[%s4439_s21 + $0x98] sm:$0xff] %vm4891_vm1, %v2521_v45  ;;  %vm4898_vm1 = vmmov %vm4851_vm0 }
 0x1d2   : > { %vm2466_vm2 = vcmp.ge.f32.partialorder %v2434_v13, 0.0  ;;  %v2498_v37 = vmul.f32 0.2, %v2434_v13  ;;  %v2390_v31 = vadd.f32 %v2340_v44, %v2013_v7 }
 0x1d4   : > { %v2530_v14 = vsel %vm2466_vm2, %v2434_v13, %v2498_v37  ;;  %v2426_v9 = vadd.f32 %v4418_v41, %v2390_v31 }
 0x1d5   : > { %2562 = vst.msk [vmem:[%s4439_s21 + $0xe0] sm:$0xff] %vm4851_vm0, %v2530_v14  ;;  %v2342_v38 = vpop.f32.mrf.mxu2  ;;  %v2362_v35 = vpop.f32.mrf.mxu3 }
 0x1d6   : > { %vm2458_vm5 = vcmp.ge.f32.partialorder %v2426_v9, 0.0  ;;  %v2490_v53 = vmul.f32 0.2, %v2426_v9  ;;  %v2399_v43 = vadd.f32 %v2362_v35, %v2035_v28 }
 0x1d7   : > { %v1875_v55 = vpop.f32.mrf.mxu0 }
 0x1d8   : > { %v2522_v23 = vsel %vm2458_vm5, %v2426_v9, %v2490_v53  ;;  %v2435_v33 = vadd.f32 %v4418_v41, %v2399_v43  ;;  %v2015_v21 = vadd.f32 %v2014_v15, %v1875_v55  ;;  %v2017_v36 = vpop.f32.mrf.mxu1 }
 0x1d9   : > { %2554 = vst.msk [vmem:[%s4439_s21 + $0xa0] sm:$0xff] %vm4892_vm14, %v2522_v23 }
 0x1da   : > { %vm2467_vm7 = vcmp.ge.f32.partialorder %v2435_v33, 0.0  ;;  %v2499_v26 = vmul.f32 0.2, %v2435_v33  ;;  %v2391_v30 = vadd.f32 %v2342_v38, %v2015_v21 }
 0x1dc   : > { %v2531_v46 = vsel %vm2467_vm7, %v2435_v33, %v2499_v26  ;;  %v2427_v39 = vadd.f32 %v4418_v41, %v2391_v30 }
 0x1dd   : > { %2563 = vst.msk [vmem:[%s4439_s21 + $0xe8] sm:$0xff] %vm4893_vm3, %v2531_v46  ;;  %v2365_v54 = vpop.f32.mrf.mxu3  ;;  %v2345_v27 = vpop.f32.mrf.mxu2 }
 0x1de   : > { %vm2459_vm11 = vcmp.ge.f32.partialorder %v2427_v39, 0.0  ;;  %v2491_v34 = vmul.f32 0.2, %v2427_v39  ;;  %v2400_v52 = vadd.f32 %v2365_v54, %v2038_v2 }
 0x1df   : > { %v1878_v49 = vpop.f32.mrf.mxu0 }
 0x1e0   : > { %v2523_v6 = vsel %vm2459_vm11, %v2427_v39, %v2491_v34  ;;  %v2436_v4 = vadd.f32 %v4418_v41, %v2400_v52  ;;  %v2018_v51 = vadd.f32 %v2017_v36, %v1878_v49  ;;  %v2019_v48 = vpop.f32.mrf.mxu1 }
 0x1e1   : > { %2555 = vst.msk [vmem:[%s4439_s21 + $0xa8] sm:$0xff] %vm4894_vm10, %v2523_v6 }
 0x1e2   : > { %vm2468_vm12 = vcmp.ge.f32.partialorder %v2436_v4, 0.0  ;;  %v2500_v40 = vmul.f32 0.2, %v2436_v4  ;;  %v2392_v22 = vadd.f32 %v2345_v27, %v2018_v51 }
 0x1e4   : > { %v2532_v60 = vsel %vm2468_vm12, %v2436_v4, %v2500_v40  ;;  %v2428_v61 = vadd.f32 %v4418_v41, %v2392_v22 }
 0x1e5   : > { %2564 = vst.msk [vmem:[%s4439_s21 + $0xf0] sm:$0xff] %vm4895_vm4, %v2532_v60  ;;  %v2367_v29 = vpop.f32.mrf.mxu3  ;;  %v2347_v56 = vpop.f32.mrf.mxu2 }
 0x1e6   : > { %vm2460_vm6 = vcmp.ge.f32.partialorder %v2428_v61, 0.0  ;;  %v2492_v12 = vmul.f32 0.2, %v2428_v61  ;;  %v2401_v24 = vadd.f32 %v2367_v29, %v2040_v11 }
 0x1e7   : > { %v1880_v1 = vpop.f32.mrf.mxu0 }
 0x1e8   : > { %v2524_v19 = vsel %vm2460_vm6, %v2428_v61, %v2492_v12  ;;  %v2437_v10 = vadd.f32 %v4418_v41, %v2401_v24  ;;  %v2020_v63 = vadd.f32 %v2019_v48, %v1880_v1 }
 0x1e9   : > { %2556 = vst.msk [vmem:[%s4439_s21 + $0xb0] sm:$0xff] %vm4896_vm8, %v2524_v19 }
 0x1ea   : > { %vm2469_vm13 = vcmp.ge.f32.partialorder %v2437_v10, 0.0  ;;  %v2501_v17 = vmul.f32 0.2, %v2437_v10  ;;  %v2393_v18 = vadd.f32 %v2347_v56, %v2020_v63 }
 0x1ec   : > { %v2533_v59 = vsel %vm2469_vm13, %v2437_v10, %v2501_v17  ;;  %v2429_v16 = vadd.f32 %v4418_v41, %v2393_v18 }
 0x1ed   : > { %2565 = vst.msk [vmem:[%s4439_s21 + $0xf8] sm:$0xff] %vm4897_vm9, %v2533_v59 }
 0x1ee   : > { %vm2461_vm15 = vcmp.ge.f32.partialorder %v2429_v16, 0.0  ;;  %v2493_v8 = vmul.f32 0.2, %v2429_v16 }
 0x1f0   : > { %v2525_v25 = vsel %vm2461_vm15, %v2429_v16, %v2493_v8 }
 0x1f1   : > { %2557 = vst.msk [vmem:[%s4439_s21 + $0xb8] sm:$0xff] %vm4898_vm1, %v2525_v25 }
 0x1f2 PF: > { %s13_s14 = sadd.s32 1, %s2925_s14   ;;  %s4899_s12 = smov %s2921_s13 }
 0x1f3   : > { %p10_p5 = scmp.ge.s32.totalorder %s13_s14, 4   ;;  %s4900_s13 = smov %s4902_s15 }
 0x1f5   :  { %12 = sbr.rel (!%p10_p5) target bundleno = 2 (0x2), region = 62 }

</bundles_post_ra>
